<compile_context>
chip_gen: v7x
topology: tpu7x:2x2x1
jax: 0.10.0
libtpu: 0.0.40
codegen_flags: <defaults>
</compile_context>

<pallas_src>
import functools

import jax
import jax.numpy as jnp
from jax.experimental import pallas as pl
from jax.experimental.pallas import tpu as pltpu


def _round_up(x, m):
    return (x + m - 1) // m * m


def _pick_tc(T, TB, H_pad, budget_bytes=20 * 1024 * 1024):
    """Timesteps per grid step, sized against a conservative VMEM budget."""
    tc = min(T, 32)
    while tc > 1:
        emb_bytes = 2 * tc * TB * H_pad * 2        # double-buffered bf16 emb chunk
        ih_bytes = tc * TB * 3 * H_pad * 4         # f32 hoisted input projection
        if emb_bytes + ih_bytes <= budget_bytes:
            break
        tc //= 2
    return tc


def _pack_w(w, H, H_pad):
    """(3, H, H) per-gate weights (used as x @ W) -> (H_pad, 3*H_pad) bf16, gates [r|z|n]."""
    w_p = jnp.pad(w, ((0, 0), (0, H_pad - H), (0, H_pad - H)))
    return jnp.transpose(w_p, (1, 0, 2)).reshape(H_pad, 3 * H_pad).astype(jnp.bfloat16)


def _make_gru_kernel(tc, H, TB):
    """GRU recurrence over one (batch-tile, time-chunk) block.

    Input projection for the whole chunk is one wide matmul; the serial loop
    only carries the h @ W_hh matmul and the gate math.
    """

    def kernel(nchunks_ref,  # SMEM (1,) int32: number of non-padded time chunks (scalar prefetch)
               emb_ref,      # (tc, TB, H)  bf16 time-major embeddings of this chunk
               len_ref,      # (TB, 1)      int32 sequence lengths
               wih_ref,      # (H, 3H)      bf16  x @ W_ih, gates [r|z|n]
               whh_ref,      # (H, 3H)      bf16  h @ W_hh, gates [r|z|n]
               bfused_ref,   # (1, 3H)      f32   [b_ir+b_hr | b_iz+b_hz | b_in]
               bhn_ref,      # (1, H)       f32   b_hn (stays inside r*(...))
               h_ref,        # (TB, H)      f32   output: final hidden (resident accumulator)
               ih_ref):      # (tc, TB, 3H) f32   VMEM scratch: hoisted input projection
        c = pl.program_id(1)

        @pl.when(c == 0)
        def _init():
            h_ref[...] = jnp.zeros_like(h_ref)

        # Skip chunks that lie entirely in the padded tail (their DMA is also
        # elided via the clamped emb index_map).
        @pl.when(c < nchunks_ref[0])
        def _chunk():
            # ---- hoisted input projection: one big MXU matmul per chunk ----
            x_all = emb_ref[...].reshape(tc * TB, H)                       # bf16
            ih_all = jnp.dot(x_all, wih_ref[...],
                             preferred_element_type=jnp.float32)
            ih_all = ih_all + jnp.broadcast_to(bfused_ref[...], (tc * TB, 3 * H))
            ih_ref[...] = ih_all.reshape(tc, TB, 3 * H)

            whh = whh_ref[...]
            bhn = jnp.broadcast_to(bhn_ref[...], (TB, H))   # hoisted broadcast
            lens = len_ref[...]
            t0 = c * tc

            def step(i, h):
                ih_t = ih_ref[i]                                           # (TB, 3H) f32
                hh = jnp.dot(h.astype(jnp.bfloat16), whh,
                             preferred_element_type=jnp.float32)           # (TB, 3H)
                r = jax.nn.sigmoid(ih_t[:, 0 * H:1 * H] + hh[:, 0 * H:1 * H])
                z = jax.nn.sigmoid(ih_t[:, 1 * H:2 * H] + hh[:, 1 * H:2 * H])
                n = jnp.tanh(ih_t[:, 2 * H:3 * H] + r * (hh[:, 2 * H:3 * H] + bhn))
                h_new = (1.0 - z) * n + z * h
                # pack_padded_sequence semantics: rows stop updating after len steps.
                return jnp.where(t0 + i < lens, h_new, h)

            h_ref[...] = jax.lax.fori_loop(0, tc, step, h_ref[...],
                                           unroll=min(tc, 8))

    return kernel


def _linear_kernel(h_ref, w_ref, b_ref, out_ref):
    # Output head: (B, H) @ (H, TN) + (1, TN), lane-dense padded item dim.
    out_ref[...] = (
        jnp.dot(h_ref[...], w_ref[...], preferred_element_type=jnp.float32)
        + b_ref[...]
    )


@functools.partial(jax.jit, static_argnames=("item_num",))
def gru_forward(states, len_states, params, *, item_num):
    """states: (B, T) int32 item ids; len_states: (B,) int32 lengths."""
    emb_table = params["emb"]                     # (item_num + 1, H)
    H = emb_table.shape[1]
    B, T = states.shape

    # ---- padding / tiling choices (all static at trace time) ----
    H_pad = _round_up(H, 128)                     # lane-aligned gate slices
    if B <= 128:
        B_pad = _round_up(B, 16)                  # bf16 sublane packing
        TB = B_pad
    else:
        B_pad = _round_up(B, 128)
        TB = 128
    nb = B_pad // TB

    tc = _pick_tc(T, TB, H_pad)                   # timesteps per grid step
    num_chunks = pl.cdiv(T, tc)
    T_pad = num_chunks * tc

    N_pad = _round_up(item_num, 512)              # lane-dense, >=512-wide head tiles
    TN = 512

    # ---- plain-JAX glue: time-major embedding gather, layout, param packing ----
    emb_table_p = jnp.pad(emb_table, ((0, 0), (0, H_pad - H)))
    emb = jnp.take(emb_table_p, states.T, axis=0)                  # (T, B, H_pad), no transpose pass
    emb = jnp.pad(emb, ((0, T_pad - T), (0, B_pad - B), (0, 0))).astype(jnp.bfloat16)

    lens_i32 = len_states.astype(jnp.int32)
    lens = jnp.pad(lens_i32, (0, B_pad - B)).reshape(B_pad, 1)
    maxlen = jnp.max(lens_i32)
    nchunks = jnp.maximum((maxlen + tc - 1) // tc, 1).astype(jnp.int32).reshape(1)

    # (3, H, H) -> (H_pad, 3H_pad), gates [r|z|n], bf16 for the MXU.
    w_ih = _pack_w(params["w_ih"], H, H_pad)
    w_hh = _pack_w(params["w_hh"], H, H_pad)
    b_ih_p = jnp.pad(params["b_ih"], ((0, 0), (0, 0), (0, H_pad - H)))
    b_hh_p = jnp.pad(params["b_hh"], ((0, 0), (0, 0), (0, H_pad - H)))
    # Fold b_hh_r / b_hh_z into the hoisted bias; keep b_hh_n separate
    # (it sits inside the r * (...) term in the PyTorch GRU equations).
    b_fused = jnp.concatenate(
        [b_ih_p[0] + b_hh_p[0], b_ih_p[1] + b_hh_p[1], b_ih_p[2]],
        axis=-1).astype(jnp.float32)                               # (1, 3*H_pad)
    b_hn = b_hh_p[2].astype(jnp.float32)                           # (1, H_pad)

    w_out = jnp.pad(params["w_out"],
                    ((0, H_pad - H), (0, N_pad - item_num))).astype(jnp.bfloat16)
    b_out = jnp.pad(params["b_out"], ((0, 0), (0, N_pad - item_num))).astype(jnp.float32)

    # ---- kernel 1: sequential GRU recurrence (batch tiles parallel, time arbitrary) ----
    # TODO(synk): could single-buffer the constant weight blocks (pl.Buffered(1))
    # to shave VMEM on v7x; left default double-buffered for robustness.
    h_final = pl.pallas_call(
        _make_gru_kernel(tc, H_pad, TB),
        out_shape=jax.ShapeDtypeStruct((B_pad, H_pad), jnp.float32),
        grid_spec=pltpu.PrefetchScalarGridSpec(
            num_scalar_prefetch=1,
            grid=(nb, num_chunks),
            in_specs=[
                # Clamp the chunk index for padded-tail chunks so the pipeliner
                # re-requests the same block and elides the DMA.
                pl.BlockSpec((tc, TB, H_pad),
                             lambda b, c, n: (jnp.minimum(c, n[0] - 1), b, 0)),
                pl.BlockSpec((TB, 1), lambda b, c, n: (b, 0)),            # lengths
                pl.BlockSpec((H_pad, 3 * H_pad), lambda b, c, n: (0, 0)),  # W_ih cat
                pl.BlockSpec((H_pad, 3 * H_pad), lambda b, c, n: (0, 0)),  # W_hh cat
                pl.BlockSpec((1, 3 * H_pad), lambda b, c, n: (0, 0)),      # fused bias
                pl.BlockSpec((1, H_pad), lambda b, c, n: (0, 0)),          # b_hn
            ],
            out_specs=pl.BlockSpec((TB, H_pad), lambda b, c, n: (b, 0)),   # resident hidden
            scratch_shapes=[pltpu.VMEM((tc, TB, 3 * H_pad), jnp.float32)],
        ),
        compiler_params=pltpu.CompilerParams(
            dimension_semantics=("parallel", "arbitrary"),
            vmem_limit_bytes=32 * 1024 * 1024),
    )(nchunks, emb, lens, w_ih, w_hh, b_fused, b_hn)

    # ---- kernel 2: output Linear head, tiled over the (padded) item dim ----
    out_pad = pl.pallas_call(
        _linear_kernel,
        out_shape=jax.ShapeDtypeStruct((B_pad, N_pad), jnp.float32),
        grid=(N_pad // TN,),
        in_specs=[
            pl.BlockSpec((B_pad, H_pad), lambda j: (0, 0)),
            pl.BlockSpec((H_pad, TN), lambda j: (0, j)),
            pl.BlockSpec((1, TN), lambda j: (0, j)),
        ],
        out_specs=pl.BlockSpec((B_pad, TN), lambda j: (0, j)),
        compiler_params=pltpu.CompilerParams(
            dimension_semantics=("parallel",)),
    )(h_final.astype(jnp.bfloat16), w_out, b_out)

    return out_pad[:B, :item_num]


def init_params(key, hidden_size, item_num):
    """Deterministic synthetic parameters matching the PyTorch module's shapes."""
    H = hidden_size
    k = 1.0 / jnp.sqrt(H)
    keys = jax.random.split(key, 7)
    params = {
        # nn.Embedding(item_num + 1, H), init N(0, 0.01)
        "emb": 0.01 * jax.random.normal(keys[0], (item_num + 1, H), jnp.float32),
        # nn.GRU weights: PyTorch stores (3H, H) with gate order [r, z, n];
        # here stored as (3, H, H), already transposed so the kernel does x @ W.
        "w_ih": jax.random.uniform(keys[1], (3, H, H), jnp.float32, -k, k),
        "w_hh": jax.random.uniform(keys[2], (3, H, H), jnp.float32, -k, k),
        "b_ih": jax.random.uniform(keys[3], (3, 1, H), jnp.float32, -k, k),
        "b_hh": jax.random.uniform(keys[4], (3, 1, H), jnp.float32, -k, k),
        # nn.Linear(H, item_num), transposed for h @ W
        "w_out": jax.random.uniform(keys[5], (H, item_num), jnp.float32, -k, k),
        "b_out": jax.random.uniform(keys[6], (1, item_num), jnp.float32, -k, k),
    }
    return params


def gru_forward_reference(states, len_states, params, *, item_num):
    """Pure-JAX f32 reference (same math) for correctness checking."""
    emb = jnp.take(params["emb"], states, axis=0).astype(jnp.float32)  # (B, T, H)
    B, T, H = emb.shape
    h = jnp.zeros((B, H), jnp.float32)
    for t in range(T):
        x = emb[:, t, :]
        ir = x @ params["w_ih"][0] + params["b_ih"][0]
        iz = x @ params["w_ih"][1] + params["b_ih"][1]
        inn = x @ params["w_ih"][2] + params["b_ih"][2]
        hr = h @ params["w_hh"][0] + params["b_hh"][0]
        hz = h @ params["w_hh"][1] + params["b_hh"][1]
        hn = h @ params["w_hh"][2] + params["b_hh"][2]
        r = jax.nn.sigmoid(ir + hr)
        z = jax.nn.sigmoid(iz + hz)
        n = jnp.tanh(inn + r * hn)
        h_new = (1.0 - z) * n + z * h
        valid = (t < len_states.astype(jnp.int32)).reshape(B, 1)
        h = jnp.where(valid, h_new, h)
    return h @ params["w_out"] + params["b_out"]


if __name__ == "__main__":
    hidden_size = 32
    item_num = 50
    state_size = 8      # sequence length T
    batch = 4

    key = jax.random.PRNGKey(0)
    pkey, skey = jax.random.split(key)
    params = init_params(pkey, hidden_size, item_num)

    # states: padded item-id sequences (B, T); len_states: valid lengths (B,)
    states = jax.random.randint(skey, (batch, state_size), 0, item_num + 1, jnp.int32)
    len_states = jnp.array([8, 5, 3, 1], jnp.int32)

    out = gru_forward(states, len_states, params, item_num=item_num)
    out = jax.block_until_ready(out)

    ref = gru_forward_reference(states, len_states, params, item_num=item_num)
    assert out.shape == (batch, item_num)
    # bf16 MXU operands -> relaxed tolerance vs. the f32 reference.
    assert jnp.allclose(out, ref, atol=2e-2, rtol=2e-2), "mismatch vs reference"

    print("KERNEL_OK")
</pallas_src>

<mosaic_0001>
module attributes {stable_mosaic.version = 11 : i64} {
  func.func @_linear_kernel(%arg0: i32, %arg1: memref<16x128xbf16, #tpu.memory_space<vmem>>, %arg2: memref<128x512xbf16, #tpu.memory_space<vmem>>, %arg3: memref<1x512xf32, #tpu.memory_space<vmem>>, %arg4: memref<16x512xf32, #tpu.memory_space<vmem>>) attributes {dimension_semantics = [#tpu.dimension_semantics<parallel>], iteration_bounds = array<i64: 1>, scalar_prefetch = 0 : i64, scratch_operands = 0 : i64, tpu.core_type = #tpu.core_type<tc>, window_params = [{pipeline_mode = #tpu.pipeline_mode<synchronous>, transform_indices = @transform_0, window_bounds = array<i64: 16, 128>}, {transform_indices = @transform_1, window_bounds = array<i64: 128, 512>}, {transform_indices = @transform_2, window_bounds = array<i64: 1, 512>}, {transform_indices = @transform_3, window_bounds = array<i64: 16, 512>}]} {
    %c0 = arith.constant 0 : index
    %c0_0 = arith.constant 0 : index
    %0 = vector.load %arg1[%c0, %c0_0] : memref<16x128xbf16, #tpu.memory_space<vmem>>, vector<16x128xbf16>
    %c0_1 = arith.constant 0 : index
    %c0_2 = arith.constant 0 : index
    %1 = vector.load %arg2[%c0_1, %c0_2] : memref<128x512xbf16, #tpu.memory_space<vmem>>, vector<128x512xbf16>
    %cst = arith.constant dense<0.000000e+00> : vector<16x512xf32>
    %2 = tpu.matmul %0, %1, %cst {dimension_numbers = #tpu.dot_dimension_numbers<[1], [0], [0], [1], [0, 0, 1, 1], [], []>} : vector<16x128xbf16>, vector<128x512xbf16>, vector<16x512xf32> -> vector<16x512xf32>
    %c0_3 = arith.constant 0 : index
    %c0_4 = arith.constant 0 : index
    %3 = vector.load %arg3[%c0_3, %c0_4] : memref<1x512xf32, #tpu.memory_space<vmem>>, vector<1x512xf32>
    %4 = vector.broadcast %3 : vector<1x512xf32> to vector<16x512xf32>
    %5 = arith.addf %2, %4 : vector<16x512xf32>
    %c0_5 = arith.constant 0 : index
    %c0_6 = arith.constant 0 : index
    %6 = vector.load %arg4[%c0_5, %c0_6] : memref<16x512xf32, #tpu.memory_space<vmem>>, vector<16x512xf32>
    tpu.vector_store %arg4[%c0_5, %c0_6], %5 {strides = array<i32>} : memref<16x512xf32, #tpu.memory_space<vmem>>, vector<16x512xf32>,
    return
  }
  func.func @transform_0(%arg0: i32) -> (i32, i32) {
    %c0_i32 = arith.constant 0 : i32
    %c0_i32_0 = arith.constant 0 : i32
    %c0_i32_1 = arith.constant 0 : i32
    return %c0_i32, %c0_i32_0 : i32, i32
  }
  func.func @transform_1(%arg0: i32) -> (i32, i32) {
    %c0_i32 = arith.constant 0 : i32
    %c0_i32_0 = arith.constant 0 : i32
    return %c0_i32, %arg0 : i32, i32
  }
  func.func @transform_2(%arg0: i32) -> (i32, i32) {
    %c0_i32 = arith.constant 0 : i32
    %c0_i32_0 = arith.constant 0 : i32
    return %c0_i32, %arg0 : i32, i32
  }
  func.func @transform_3(%arg0: i32) -> (i32, i32) {
    %c0_i32 = arith.constant 0 : i32
    %c0_i32_0 = arith.constant 0 : i32
    return %c0_i32, %arg0 : i32, i32
  }
}

module attributes {stable_mosaic.version = 11 : i64} {
  func.func @kernel(%arg0: i32, %arg1: i32, %arg2: memref<1xi32, #tpu.memory_space<smem>>, %arg3: memref<8x16x128xbf16, #tpu.memory_space<vmem>>, %arg4: memref<16x1xi32, #tpu.memory_space<vmem>>, %arg5: memref<128x384xbf16, #tpu.memory_space<vmem>>, %arg6: memref<128x384xbf16, #tpu.memory_space<vmem>>, %arg7: memref<1x384xf32, #tpu.memory_space<vmem>>, %arg8: memref<1x128xf32, #tpu.memory_space<vmem>>, %arg9: memref<16x128xf32, #tpu.memory_space<vmem>>, %arg10: memref<8x16x384xf32, #tpu.memory_space<vmem>>) attributes {dimension_semantics = [#tpu.dimension_semantics<parallel>, #tpu.dimension_semantics<arbitrary>], iteration_bounds = array<i64: 1, 1>, scalar_prefetch = 1 : i64, scratch_operands = 1 : i64, tpu.core_type = #tpu.core_type<tc>, window_params = [{transform_indices = @transform_0, window_bounds = array<i64: 8, 16, 128>}, {transform_indices = @transform_1, window_bounds = array<i64: 16, 1>}, {pipeline_mode = #tpu.pipeline_mode<synchronous>, transform_indices = @transform_2, window_bounds = array<i64: 128, 384>}, {pipeline_mode = #tpu.pipeline_mode<synchronous>, transform_indices = @transform_3, window_bounds = array<i64: 128, 384>}, {pipeline_mode = #tpu.pipeline_mode<synchronous>, transform_indices = @transform_4, window_bounds = array<i64: 1, 384>}, {pipeline_mode = #tpu.pipeline_mode<synchronous>, transform_indices = @transform_5, window_bounds = array<i64: 1, 128>}, {transform_indices = @transform_6, window_bounds = array<i64: 16, 128>}]} {
    %c0_i32 = arith.constant 0 : i32
    %0 = arith.cmpi eq, %arg1, %c0_i32 : i32
    %1 = arith.extui %0 : i1 to i32
    %c0_i32_0 = arith.constant 0 : i32
    %2 = arith.cmpi ne, %1, %c0_i32_0 : i32
    scf.if %2 {
      %cst = arith.constant 0.000000e+00 : f32
      %7 = vector.broadcast %cst : f32 to vector<16x128xf32>
      %c0_2 = arith.constant 0 : index
      %c0_3 = arith.constant 0 : index
      %8 = vector.load %arg9[%c0_2, %c0_3] : memref<16x128xf32, #tpu.memory_space<vmem>>, vector<16x128xf32>
      tpu.vector_store %arg9[%c0_2, %c0_3], %7 {strides = array<i32>} : memref<16x128xf32, #tpu.memory_space<vmem>>, vector<16x128xf32>,
    } else {
    }
    %c0 = arith.constant 0 : index
    %3 = memref.load %arg2[%c0] : memref<1xi32, #tpu.memory_space<smem>>
    %4 = arith.cmpi slt, %arg1, %3 : i32
    %5 = arith.extui %4 : i1 to i32
    %c0_i32_1 = arith.constant 0 : i32
    %6 = arith.cmpi ne, %5, %c0_i32_1 : i32
    scf.if %6 {
      %c0_2 = arith.constant 0 : index
      %c0_3 = arith.constant 0 : index
      %c0_4 = arith.constant 0 : index
      %7 = vector.load %arg3[%c0_2, %c0_3, %c0_4] : memref<8x16x128xbf16, #tpu.memory_space<vmem>>, vector<8x16x128xbf16>
      %8 = vector.shape_cast %7 : vector<8x16x128xbf16> to vector<128x128xbf16>
      %c0_5 = arith.constant 0 : index
      %c0_6 = arith.constant 0 : index
      %9 = vector.load %arg5[%c0_5, %c0_6] : memref<128x384xbf16, #tpu.memory_space<vmem>>, vector<128x384xbf16>
      %cst = arith.constant dense<0.000000e+00> : vector<128x384xf32>
      %10 = tpu.matmul %8, %9, %cst {dimension_numbers = #tpu.dot_dimension_numbers<[1], [0], [0], [1], [0, 0, 1, 1], [], []>} : vector<128x128xbf16>, vector<128x384xbf16>, vector<128x384xf32> -> vector<128x384xf32>
      %c0_7 = arith.constant 0 : index
      %c0_8 = arith.constant 0 : index
      %11 = vector.load %arg7[%c0_7, %c0_8] : memref<1x384xf32, #tpu.memory_space<vmem>>, vector<1x384xf32>
      %12 = vector.shape_cast %11 : vector<1x384xf32> to vector<1x384xf32>
      %13 = vector.broadcast %12 : vector<1x384xf32> to vector<128x384xf32>
      %14 = arith.addf %10, %13 : vector<128x384xf32>
      %15 = vector.shape_cast %14 : vector<128x384xf32> to vector<8x16x384xf32>
      %c0_9 = arith.constant 0 : index
      %c0_10 = arith.constant 0 : index
      %c0_11 = arith.constant 0 : index
      %16 = vector.load %arg10[%c0_9, %c0_10, %c0_11] : memref<8x16x384xf32, #tpu.memory_space<vmem>>, vector<8x16x384xf32>
      tpu.vector_store %arg10[%c0_9, %c0_10, %c0_11], %15 {strides = array<i32>} : memref<8x16x384xf32, #tpu.memory_space<vmem>>, vector<8x16x384xf32>,
      %c0_12 = arith.constant 0 : index
      %c0_13 = arith.constant 0 : index
      %17 = vector.load %arg6[%c0_12, %c0_13] : memref<128x384xbf16, #tpu.memory_space<vmem>>, vector<128x384xbf16>
      %c0_14 = arith.constant 0 : index
      %c0_15 = arith.constant 0 : index
      %18 = vector.load %arg8[%c0_14, %c0_15] : memref<1x128xf32, #tpu.memory_space<vmem>>, vector<1x128xf32>
      %19 = vector.shape_cast %18 : vector<1x128xf32> to vector<1x128xf32>
      %20 = vector.broadcast %19 : vector<1x128xf32> to vector<16x128xf32>
      %c0_16 = arith.constant 0 : index
      %c0_17 = arith.constant 0 : index
      %21 = vector.load %arg4[%c0_16, %c0_17] : memref<16x1xi32, #tpu.memory_space<vmem>>, vector<16x1xi32>
      %c8_i32 = arith.constant 8 : i32
      %22 = arith.muli %arg1, %c8_i32 : i32
      %c0_18 = arith.constant 0 : index
      %c0_19 = arith.constant 0 : index
      %23 = vector.load %arg9[%c0_18, %c0_19] : memref<16x128xf32, #tpu.memory_space<vmem>>, vector<16x128xf32>
      %c0_i32_20 = arith.constant 0 : i32
      %24 = arith.index_cast %c0_i32_20 : i32 to index
      %c0_21 = arith.constant 0 : index
      %c0_22 = arith.constant 0 : index
      %25 = vector.load %arg10[%24, %c0_21, %c0_22] : memref<8x16x384xf32, #tpu.memory_space<vmem>>, vector<1x16x384xf32>
      %26 = vector.shape_cast %25 : vector<1x16x384xf32> to vector<16x384xf32>
      %27 = arith.truncf %23 : vector<16x128xf32> to vector<16x128xbf16>
      %cst_23 = arith.constant dense<0.000000e+00> : vector<16x384xf32>
      %28 = tpu.matmul %27, %17, %cst_23 {dimension_numbers = #tpu.dot_dimension_numbers<[1], [0], [0], [1], [0, 0, 1, 1], [], []>} : vector<16x128xbf16>, vector<128x384xbf16>, vector<16x384xf32> -> vector<16x384xf32>
      %29 = vector.extract_strided_slice %26 {offsets = [0, 0], sizes = [16, 128], strides = [1, 1]} : vector<16x384xf32> to vector<16x128xf32>
      %30 = vector.extract_strided_slice %28 {offsets = [0, 0], sizes = [16, 128], strides = [1, 1]} : vector<16x384xf32> to vector<16x128xf32>
      %31 = arith.addf %29, %30 : vector<16x128xf32>
      %32 = arith.negf %31 : vector<16x128xf32>
      %33 = math.exp %32 : vector<16x128xf32>
      %cst_24 = arith.constant 1.000000e+00 : f32
      %34 = vector.broadcast %cst_24 : f32 to vector<16x128xf32>
      %35 = arith.addf %34, %33 : vector<16x128xf32>
      %36 = arith.divf %34, %35 : vector<16x128xf32>
      %37 = vector.extract_strided_slice %26 {offsets = [0, 128], sizes = [16, 128], strides = [1, 1]} : vector<16x384xf32> to vector<16x128xf32>
      %38 = vector.extract_strided_slice %28 {offsets = [0, 128], sizes = [16, 128], strides = [1, 1]} : vector<16x384xf32> to vector<16x128xf32>
      %39 = arith.addf %37, %38 : vector<16x128xf32>
      %40 = arith.negf %39 : vector<16x128xf32>
      %41 = math.exp %40 : vector<16x128xf32>
      %cst_25 = arith.constant 1.000000e+00 : f32
      %42 = vector.broadcast %cst_25 : f32 to vector<16x128xf32>
      %43 = arith.addf %42, %41 : vector<16x128xf32>
      %44 = arith.divf %42, %43 : vector<16x128xf32>
      %45 = vector.extract_strided_slice %26 {offsets = [0, 256], sizes = [16, 128], strides = [1, 1]} : vector<16x384xf32> to vector<16x128xf32>
      %46 = vector.extract_strided_slice %28 {offsets = [0, 256], sizes = [16, 128], strides = [1, 1]} : vector<16x384xf32> to vector<16x128xf32>
      %47 = arith.addf %46, %20 : vector<16x128xf32>
      %48 = arith.mulf %36, %47 : vector<16x128xf32>
      %49 = arith.addf %45, %48 : vector<16x128xf32>
      %50 = math.tanh %49 : vector<16x128xf32>
      %cst_26 = arith.constant 1.000000e+00 : f32
      %51 = vector.broadcast %cst_26 : f32 to vector<16x128xf32>
      %52 = arith.subf %51, %44 : vector<16x128xf32>
      %53 = arith.mulf %52, %50 : vector<16x128xf32>
      %54 = arith.mulf %44, %23 : vector<16x128xf32>
      %55 = arith.addf %53, %54 : vector<16x128xf32>
      %56 = arith.addi %22, %c0_i32_20 : i32
      %57 = vector.broadcast %56 : i32 to vector<16x1xi32>
      %58 = arith.cmpi slt, %57, %21 : vector<16x1xi32>
      %59 = vector.shape_cast %58 : vector<16x1xi1> to vector<16x1xi1>
      %60 = vector.broadcast %59 : vector<16x1xi1> to vector<16x128xi1>
      %61 = arith.select %60, %55, %23 : vector<16x128xi1>, vector<16x128xf32>
      %c1_i32 = arith.constant 1 : i32
      %62 = arith.index_cast %c1_i32 : i32 to index
      %c0_27 = arith.constant 0 : index
      %c0_28 = arith.constant 0 : index
      %63 = vector.load %arg10[%62, %c0_27, %c0_28] : memref<8x16x384xf32, #tpu.memory_space<vmem>>, vector<1x16x384xf32>
      %64 = vector.shape_cast %63 : vector<1x16x384xf32> to vector<16x384xf32>
      %65 = arith.truncf %61 : vector<16x128xf32> to vector<16x128xbf16>
      %cst_29 = arith.constant dense<0.000000e+00> : vector<16x384xf32>
      %66 = tpu.matmul %65, %17, %cst_29 {dimension_numbers = #tpu.dot_dimension_numbers<[1], [0], [0], [1], [0, 0, 1, 1], [], []>} : vector<16x128xbf16>, vector<128x384xbf16>, vector<16x384xf32> -> vector<16x384xf32>
      %67 = vector.extract_strided_slice %64 {offsets = [0, 0], sizes = [16, 128], strides = [1, 1]} : vector<16x384xf32> to vector<16x128xf32>
      %68 = vector.extract_strided_slice %66 {offsets = [0, 0], sizes = [16, 128], strides = [1, 1]} : vector<16x384xf32> to vector<16x128xf32>
      %69 = arith.addf %67, %68 : vector<16x128xf32>
      %70 = arith.negf %69 : vector<16x128xf32>
      %71 = math.exp %70 : vector<16x128xf32>
      %cst_30 = arith.constant 1.000000e+00 : f32
      %72 = vector.broadcast %cst_30 : f32 to vector<16x128xf32>
      %73 = arith.addf %72, %71 : vector<16x128xf32>
      %74 = arith.divf %72, %73 : vector<16x128xf32>
      %75 = vector.extract_strided_slice %64 {offsets = [0, 128], sizes = [16, 128], strides = [1, 1]} : vector<16x384xf32> to vector<16x128xf32>
      %76 = vector.extract_strided_slice %66 {offsets = [0, 128], sizes = [16, 128], strides = [1, 1]} : vector<16x384xf32> to vector<16x128xf32>
      %77 = arith.addf %75, %76 : vector<16x128xf32>
      %78 = arith.negf %77 : vector<16x128xf32>
      %79 = math.exp %78 : vector<16x128xf32>
      %cst_31 = arith.constant 1.000000e+00 : f32
      %80 = vector.broadcast %cst_31 : f32 to vector<16x128xf32>
      %81 = arith.addf %80, %79 : vector<16x128xf32>
      %82 = arith.divf %80, %81 : vector<16x128xf32>
      %83 = vector.extract_strided_slice %64 {offsets = [0, 256], sizes = [16, 128], strides = [1, 1]} : vector<16x384xf32> to vector<16x128xf32>
      %84 = vector.extract_strided_slice %66 {offsets = [0, 256], sizes = [16, 128], strides = [1, 1]} : vector<16x384xf32> to vector<16x128xf32>
      %85 = arith.addf %84, %20 : vector<16x128xf32>
      %86 = arith.mulf %74, %85 : vector<16x128xf32>
      %87 = arith.addf %83, %86 : vector<16x128xf32>
      %88 = math.tanh %87 : vector<16x128xf32>
      %cst_32 = arith.constant 1.000000e+00 : f32
      %89 = vector.broadcast %cst_32 : f32 to vector<16x128xf32>
      %90 = arith.subf %89, %82 : vector<16x128xf32>
      %91 = arith.mulf %90, %88 : vector<16x128xf32>
      %92 = arith.mulf %82, %61 : vector<16x128xf32>
      %93 = arith.addf %91, %92 : vector<16x128xf32>
      %94 = arith.addi %22, %c1_i32 : i32
      %95 = vector.broadcast %94 : i32 to vector<16x1xi32>
      %96 = arith.cmpi slt, %95, %21 : vector<16x1xi32>
      %97 = vector.shape_cast %96 : vector<16x1xi1> to vector<16x1xi1>
      %98 = vector.broadcast %97 : vector<16x1xi1> to vector<16x128xi1>
      %99 = arith.select %98, %93, %61 : vector<16x128xi1>, vector<16x128xf32>
      %c2_i32 = arith.constant 2 : i32
      %100 = arith.index_cast %c2_i32 : i32 to index
      %c0_33 = arith.constant 0 : index
      %c0_34 = arith.constant 0 : index
      %101 = vector.load %arg10[%100, %c0_33, %c0_34] : memref<8x16x384xf32, #tpu.memory_space<vmem>>, vector<1x16x384xf32>
      %102 = vector.shape_cast %101 : vector<1x16x384xf32> to vector<16x384xf32>
      %103 = arith.truncf %99 : vector<16x128xf32> to vector<16x128xbf16>
      %cst_35 = arith.constant dense<0.000000e+00> : vector<16x384xf32>
      %104 = tpu.matmul %103, %17, %cst_35 {dimension_numbers = #tpu.dot_dimension_numbers<[1], [0], [0], [1], [0, 0, 1, 1], [], []>} : vector<16x128xbf16>, vector<128x384xbf16>, vector<16x384xf32> -> vector<16x384xf32>
      %105 = vector.extract_strided_slice %102 {offsets = [0, 0], sizes = [16, 128], strides = [1, 1]} : vector<16x384xf32> to vector<16x128xf32>
      %106 = vector.extract_strided_slice %104 {offsets = [0, 0], sizes = [16, 128], strides = [1, 1]} : vector<16x384xf32> to vector<16x128xf32>
      %107 = arith.addf %105, %106 : vector<16x128xf32>
      %108 = arith.negf %107 : vector<16x128xf32>
      %109 = math.exp %108 : vector<16x128xf32>
      %cst_36 = arith.constant 1.000000e+00 : f32
      %110 = vector.broadcast %cst_36 : f32 to vector<16x128xf32>
      %111 = arith.addf %110, %109 : vector<16x128xf32>
      %112 = arith.divf %110, %111 : vector<16x128xf32>
      %113 = vector.extract_strided_slice %102 {offsets = [0, 128], sizes = [16, 128], strides = [1, 1]} : vector<16x384xf32> to vector<16x128xf32>
      %114 = vector.extract_strided_slice %104 {offsets = [0, 128], sizes = [16, 128], strides = [1, 1]} : vector<16x384xf32> to vector<16x128xf32>
      %115 = arith.addf %113, %114 : vector<16x128xf32>
      %116 = arith.negf %115 : vector<16x128xf32>
      %117 = math.exp %116 : vector<16x128xf32>
      %cst_37 = arith.constant 1.000000e+00 : f32
      %118 = vector.broadcast %cst_37 : f32 to vector<16x128xf32>
      %119 = arith.addf %118, %117 : vector<16x128xf32>
      %120 = arith.divf %118, %119 : vector<16x128xf32>
      %121 = vector.extract_strided_slice %102 {offsets = [0, 256], sizes = [16, 128], strides = [1, 1]} : vector<16x384xf32> to vector<16x128xf32>
      %122 = vector.extract_strided_slice %104 {offsets = [0, 256], sizes = [16, 128], strides = [1, 1]} : vector<16x384xf32> to vector<16x128xf32>
      %123 = arith.addf %122, %20 : vector<16x128xf32>
      %124 = arith.mulf %112, %123 : vector<16x128xf32>
      %125 = arith.addf %121, %124 : vector<16x128xf32>
      %126 = math.tanh %125 : vector<16x128xf32>
      %cst_38 = arith.constant 1.000000e+00 : f32
      %127 = vector.broadcast %cst_38 : f32 to vector<16x128xf32>
      %128 = arith.subf %127, %120 : vector<16x128xf32>
      %129 = arith.mulf %128, %126 : vector<16x128xf32>
      %130 = arith.mulf %120, %99 : vector<16x128xf32>
      %131 = arith.addf %129, %130 : vector<16x128xf32>
      %132 = arith.addi %22, %c2_i32 : i32
      %133 = vector.broadcast %132 : i32 to vector<16x1xi32>
      %134 = arith.cmpi slt, %133, %21 : vector<16x1xi32>
      %135 = vector.shape_cast %134 : vector<16x1xi1> to vector<16x1xi1>
      %136 = vector.broadcast %135 : vector<16x1xi1> to vector<16x128xi1>
      %137 = arith.select %136, %131, %99 : vector<16x128xi1>, vector<16x128xf32>
      %c3_i32 = arith.constant 3 : i32
      %138 = arith.index_cast %c3_i32 : i32 to index
      %c0_39 = arith.constant 0 : index
      %c0_40 = arith.constant 0 : index
      %139 = vector.load %arg10[%138, %c0_39, %c0_40] : memref<8x16x384xf32, #tpu.memory_space<vmem>>, vector<1x16x384xf32>
      %140 = vector.shape_cast %139 : vector<1x16x384xf32> to vector<16x384xf32>
      %141 = arith.truncf %137 : vector<16x128xf32> to vector<16x128xbf16>
      %cst_41 = arith.constant dense<0.000000e+00> : vector<16x384xf32>
      %142 = tpu.matmul %141, %17, %cst_41 {dimension_numbers = #tpu.dot_dimension_numbers<[1], [0], [0], [1], [0, 0, 1, 1], [], []>} : vector<16x128xbf16>, vector<128x384xbf16>, vector<16x384xf32> -> vector<16x384xf32>
      %143 = vector.extract_strided_slice %140 {offsets = [0, 0], sizes = [16, 128], strides = [1, 1]} : vector<16x384xf32> to vector<16x128xf32>
      %144 = vector.extract_strided_slice %142 {offsets = [0, 0], sizes = [16, 128], strides = [1, 1]} : vector<16x384xf32> to vector<16x128xf32>
      %145 = arith.addf %143, %144 : vector<16x128xf32>
      %146 = arith.negf %145 : vector<16x128xf32>
      %147 = math.exp %146 : vector<16x128xf32>
      %cst_42 = arith.constant 1.000000e+00 : f32
      %148 = vector.broadcast %cst_42 : f32 to vector<16x128xf32>
      %149 = arith.addf %148, %147 : vector<16x128xf32>
      %150 = arith.divf %148, %149 : vector<16x128xf32>
      %151 = vector.extract_strided_slice %140 {offsets = [0, 128], sizes = [16, 128], strides = [1, 1]} : vector<16x384xf32> to vector<16x128xf32>
      %152 = vector.extract_strided_slice %142 {offsets = [0, 128], sizes = [16, 128], strides = [1, 1]} : vector<16x384xf32> to vector<16x128xf32>
      %153 = arith.addf %151, %152 : vector<16x128xf32>
      %154 = arith.negf %153 : vector<16x128xf32>
      %155 = math.exp %154 : vector<16x128xf32>
      %cst_43 = arith.constant 1.000000e+00 : f32
      %156 = vector.broadcast %cst_43 : f32 to vector<16x128xf32>
      %157 = arith.addf %156, %155 : vector<16x128xf32>
      %158 = arith.divf %156, %157 : vector<16x128xf32>
      %159 = vector.extract_strided_slice %140 {offsets = [0, 256], sizes = [16, 128], strides = [1, 1]} : vector<16x384xf32> to vector<16x128xf32>
      %160 = vector.extract_strided_slice %142 {offsets = [0, 256], sizes = [16, 128], strides = [1, 1]} : vector<16x384xf32> to vector<16x128xf32>
      %161 = arith.addf %160, %20 : vector<16x128xf32>
      %162 = arith.mulf %150, %161 : vector<16x128xf32>
      %163 = arith.addf %159, %162 : vector<16x128xf32>
      %164 = math.tanh %163 : vector<16x128xf32>
      %cst_44 = arith.constant 1.000000e+00 : f32
      %165 = vector.broadcast %cst_44 : f32 to vector<16x128xf32>
      %166 = arith.subf %165, %158 : vector<16x128xf32>
      %167 = arith.mulf %166, %164 : vector<16x128xf32>
      %168 = arith.mulf %158, %137 : vector<16x128xf32>
      %169 = arith.addf %167, %168 : vector<16x128xf32>
      %170 = arith.addi %22, %c3_i32 : i32
      %171 = vector.broadcast %170 : i32 to vector<16x1xi32>
      %172 = arith.cmpi slt, %171, %21 : vector<16x1xi32>
      %173 = vector.shape_cast %172 : vector<16x1xi1> to vector<16x1xi1>
      %174 = vector.broadcast %173 : vector<16x1xi1> to vector<16x128xi1>
      %175 = arith.select %174, %169, %137 : vector<16x128xi1>, vector<16x128xf32>
      %c4_i32 = arith.constant 4 : i32
      %176 = arith.index_cast %c4_i32 : i32 to index
      %c0_45 = arith.constant 0 : index
      %c0_46 = arith.constant 0 : index
      %177 = vector.load %arg10[%176, %c0_45, %c0_46] : memref<8x16x384xf32, #tpu.memory_space<vmem>>, vector<1x16x384xf32>
      %178 = vector.shape_cast %177 : vector<1x16x384xf32> to vector<16x384xf32>
      %179 = arith.truncf %175 : vector<16x128xf32> to vector<16x128xbf16>
      %cst_47 = arith.constant dense<0.000000e+00> : vector<16x384xf32>
      %180 = tpu.matmul %179, %17, %cst_47 {dimension_numbers = #tpu.dot_dimension_numbers<[1], [0], [0], [1], [0, 0, 1, 1], [], []>} : vector<16x128xbf16>, vector<128x384xbf16>, vector<16x384xf32> -> vector<16x384xf32>
      %181 = vector.extract_strided_slice %178 {offsets = [0, 0], sizes = [16, 128], strides = [1, 1]} : vector<16x384xf32> to vector<16x128xf32>
      %182 = vector.extract_strided_slice %180 {offsets = [0, 0], sizes = [16, 128], strides = [1, 1]} : vector<16x384xf32> to vector<16x128xf32>
      %183 = arith.addf %181, %182 : vector<16x128xf32>
      %184 = arith.negf %183 : vector<16x128xf32>
      %185 = math.exp %184 : vector<16x128xf32>
      %cst_48 = arith.constant 1.000000e+00 : f32
      %186 = vector.broadcast %cst_48 : f32 to vector<16x128xf32>
      %187 = arith.addf %186, %185 : vector<16x128xf32>
      %188 = arith.divf %186, %187 : vector<16x128xf32>
      %189 = vector.extract_strided_slice %178 {offsets = [0, 128], sizes = [16, 128], strides = [1, 1]} : vector<16x384xf32> to vector<16x128xf32>
      %190 = vector.extract_strided_slice %180 {offsets = [0, 128], sizes = [16, 128], strides = [1, 1]} : vector<16x384xf32> to vector<16x128xf32>
      %191 = arith.addf %189, %190 : vector<16x128xf32>
      %192 = arith.negf %191 : vector<16x128xf32>
      %193 = math.exp %192 : vector<16x128xf32>
      %cst_49 = arith.constant 1.000000e+00 : f32
      %194 = vector.broadcast %cst_49 : f32 to vector<16x128xf32>
      %195 = arith.addf %194, %193 : vector<16x128xf32>
      %196 = arith.divf %194, %195 : vector<16x128xf32>
      %197 = vector.extract_strided_slice %178 {offsets = [0, 256], sizes = [16, 128], strides = [1, 1]} : vector<16x384xf32> to vector<16x128xf32>
      %198 = vector.extract_strided_slice %180 {offsets = [0, 256], sizes = [16, 128], strides = [1, 1]} : vector<16x384xf32> to vector<16x128xf32>
      %199 = arith.addf %198, %20 : vector<16x128xf32>
      %200 = arith.mulf %188, %199 : vector<16x128xf32>
      %201 = arith.addf %197, %200 : vector<16x128xf32>
      %202 = math.tanh %201 : vector<16x128xf32>
      %cst_50 = arith.constant 1.000000e+00 : f32
      %203 = vector.broadcast %cst_50 : f32 to vector<16x128xf32>
      %204 = arith.subf %203, %196 : vector<16x128xf32>
      %205 = arith.mulf %204, %202 : vector<16x128xf32>
      %206 = arith.mulf %196, %175 : vector<16x128xf32>
      %207 = arith.addf %205, %206 : vector<16x128xf32>
      %208 = arith.addi %22, %c4_i32 : i32
      %209 = vector.broadcast %208 : i32 to vector<16x1xi32>
      %210 = arith.cmpi slt, %209, %21 : vector<16x1xi32>
      %211 = vector.shape_cast %210 : vector<16x1xi1> to vector<16x1xi1>
      %212 = vector.broadcast %211 : vector<16x1xi1> to vector<16x128xi1>
      %213 = arith.select %212, %207, %175 : vector<16x128xi1>, vector<16x128xf32>
      %c5_i32 = arith.constant 5 : i32
      %214 = arith.index_cast %c5_i32 : i32 to index
      %c0_51 = arith.constant 0 : index
      %c0_52 = arith.constant 0 : index
      %215 = vector.load %arg10[%214, %c0_51, %c0_52] : memref<8x16x384xf32, #tpu.memory_space<vmem>>, vector<1x16x384xf32>
      %216 = vector.shape_cast %215 : vector<1x16x384xf32> to vector<16x384xf32>
      %217 = arith.truncf %213 : vector<16x128xf32> to vector<16x128xbf16>
      %cst_53 = arith.constant dense<0.000000e+00> : vector<16x384xf32>
      %218 = tpu.matmul %217, %17, %cst_53 {dimension_numbers = #tpu.dot_dimension_numbers<[1], [0], [0], [1], [0, 0, 1, 1], [], []>} : vector<16x128xbf16>, vector<128x384xbf16>, vector<16x384xf32> -> vector<16x384xf32>
      %219 = vector.extract_strided_slice %216 {offsets = [0, 0], sizes = [16, 128], strides = [1, 1]} : vector<16x384xf32> to vector<16x128xf32>
      %220 = vector.extract_strided_slice %218 {offsets = [0, 0], sizes = [16, 128], strides = [1, 1]} : vector<16x384xf32> to vector<16x128xf32>
      %221 = arith.addf %219, %220 : vector<16x128xf32>
      %222 = arith.negf %221 : vector<16x128xf32>
      %223 = math.exp %222 : vector<16x128xf32>
      %cst_54 = arith.constant 1.000000e+00 : f32
      %224 = vector.broadcast %cst_54 : f32 to vector<16x128xf32>
      %225 = arith.addf %224, %223 : vector<16x128xf32>
      %226 = arith.divf %224, %225 : vector<16x128xf32>
      %227 = vector.extract_strided_slice %216 {offsets = [0, 128], sizes = [16, 128], strides = [1, 1]} : vector<16x384xf32> to vector<16x128xf32>
      %228 = vector.extract_strided_slice %218 {offsets = [0, 128], sizes = [16, 128], strides = [1, 1]} : vector<16x384xf32> to vector<16x128xf32>
      %229 = arith.addf %227, %228 : vector<16x128xf32>
      %230 = arith.negf %229 : vector<16x128xf32>
      %231 = math.exp %230 : vector<16x128xf32>
      %cst_55 = arith.constant 1.000000e+00 : f32
      %232 = vector.broadcast %cst_55 : f32 to vector<16x128xf32>
      %233 = arith.addf %232, %231 : vector<16x128xf32>
      %234 = arith.divf %232, %233 : vector<16x128xf32>
      %235 = vector.extract_strided_slice %216 {offsets = [0, 256], sizes = [16, 128], strides = [1, 1]} : vector<16x384xf32> to vector<16x128xf32>
      %236 = vector.extract_strided_slice %218 {offsets = [0, 256], sizes = [16, 128], strides = [1, 1]} : vector<16x384xf32> to vector<16x128xf32>
      %237 = arith.addf %236, %20 : vector<16x128xf32>
      %238 = arith.mulf %226, %237 : vector<16x128xf32>
      %239 = arith.addf %235, %238 : vector<16x128xf32>
      %240 = math.tanh %239 : vector<16x128xf32>
      %cst_56 = arith.constant 1.000000e+00 : f32
      %241 = vector.broadcast %cst_56 : f32 to vector<16x128xf32>
      %242 = arith.subf %241, %234 : vector<16x128xf32>
      %243 = arith.mulf %242, %240 : vector<16x128xf32>
      %244 = arith.mulf %234, %213 : vector<16x128xf32>
      %245 = arith.addf %243, %244 : vector<16x128xf32>
      %246 = arith.addi %22, %c5_i32 : i32
      %247 = vector.broadcast %246 : i32 to vector<16x1xi32>
      %248 = arith.cmpi slt, %247, %21 : vector<16x1xi32>
      %249 = vector.shape_cast %248 : vector<16x1xi1> to vector<16x1xi1>
      %250 = vector.broadcast %249 : vector<16x1xi1> to vector<16x128xi1>
      %251 = arith.select %250, %245, %213 : vector<16x128xi1>, vector<16x128xf32>
      %c6_i32 = arith.constant 6 : i32
      %252 = arith.index_cast %c6_i32 : i32 to index
      %c0_57 = arith.constant 0 : index
      %c0_58 = arith.constant 0 : index
      %253 = vector.load %arg10[%252, %c0_57, %c0_58] : memref<8x16x384xf32, #tpu.memory_space<vmem>>, vector<1x16x384xf32>
      %254 = vector.shape_cast %253 : vector<1x16x384xf32> to vector<16x384xf32>
      %255 = arith.truncf %251 : vector<16x128xf32> to vector<16x128xbf16>
      %cst_59 = arith.constant dense<0.000000e+00> : vector<16x384xf32>
      %256 = tpu.matmul %255, %17, %cst_59 {dimension_numbers = #tpu.dot_dimension_numbers<[1], [0], [0], [1], [0, 0, 1, 1], [], []>} : vector<16x128xbf16>, vector<128x384xbf16>, vector<16x384xf32> -> vector<16x384xf32>
      %257 = vector.extract_strided_slice %254 {offsets = [0, 0], sizes = [16, 128], strides = [1, 1]} : vector<16x384xf32> to vector<16x128xf32>
      %258 = vector.extract_strided_slice %256 {offsets = [0, 0], sizes = [16, 128], strides = [1, 1]} : vector<16x384xf32> to vector<16x128xf32>
      %259 = arith.addf %257, %258 : vector<16x128xf32>
      %260 = arith.negf %259 : vector<16x128xf32>
      %261 = math.exp %260 : vector<16x128xf32>
      %cst_60 = arith.constant 1.000000e+00 : f32
      %262 = vector.broadcast %cst_60 : f32 to vector<16x128xf32>
      %263 = arith.addf %262, %261 : vector<16x128xf32>
      %264 = arith.divf %262, %263 : vector<16x128xf32>
      %265 = vector.extract_strided_slice %254 {offsets = [0, 128], sizes = [16, 128], strides = [1, 1]} : vector<16x384xf32> to vector<16x128xf32>
      %266 = vector.extract_strided_slice %256 {offsets = [0, 128], sizes = [16, 128], strides = [1, 1]} : vector<16x384xf32> to vector<16x128xf32>
      %267 = arith.addf %265, %266 : vector<16x128xf32>
      %268 = arith.negf %267 : vector<16x128xf32>
      %269 = math.exp %268 : vector<16x128xf32>
      %cst_61 = arith.constant 1.000000e+00 : f32
      %270 = vector.broadcast %cst_61 : f32 to vector<16x128xf32>
      %271 = arith.addf %270, %269 : vector<16x128xf32>
      %272 = arith.divf %270, %271 : vector<16x128xf32>
      %273 = vector.extract_strided_slice %254 {offsets = [0, 256], sizes = [16, 128], strides = [1, 1]} : vector<16x384xf32> to vector<16x128xf32>
      %274 = vector.extract_strided_slice %256 {offsets = [0, 256], sizes = [16, 128], strides = [1, 1]} : vector<16x384xf32> to vector<16x128xf32>
      %275 = arith.addf %274, %20 : vector<16x128xf32>
      %276 = arith.mulf %264, %275 : vector<16x128xf32>
      %277 = arith.addf %273, %276 : vector<16x128xf32>
      %278 = math.tanh %277 : vector<16x128xf32>
      %cst_62 = arith.constant 1.000000e+00 : f32
      %279 = vector.broadcast %cst_62 : f32 to vector<16x128xf32>
      %280 = arith.subf %279, %272 : vector<16x128xf32>
      %281 = arith.mulf %280, %278 : vector<16x128xf32>
      %282 = arith.mulf %272, %251 : vector<16x128xf32>
      %283 = arith.addf %281, %282 : vector<16x128xf32>
      %284 = arith.addi %22, %c6_i32 : i32
      %285 = vector.broadcast %284 : i32 to vector<16x1xi32>
      %286 = arith.cmpi slt, %285, %21 : vector<16x1xi32>
      %287 = vector.shape_cast %286 : vector<16x1xi1> to vector<16x1xi1>
      %288 = vector.broadcast %287 : vector<16x1xi1> to vector<16x128xi1>
      %289 = arith.select %288, %283, %251 : vector<16x128xi1>, vector<16x128xf32>
      %c7_i32 = arith.constant 7 : i32
      %290 = arith.index_cast %c7_i32 : i32 to index
      %c0_63 = arith.constant 0 : index
      %c0_64 = arith.constant 0 : index
      %291 = vector.load %arg10[%290, %c0_63, %c0_64] : memref<8x16x384xf32, #tpu.memory_space<vmem>>, vector<1x16x384xf32>
      %292 = vector.shape_cast %291 : vector<1x16x384xf32> to vector<16x384xf32>
      %293 = arith.truncf %289 : vector<16x128xf32> to vector<16x128xbf16>
      %cst_65 = arith.constant dense<0.000000e+00> : vector<16x384xf32>
      %294 = tpu.matmul %293, %17, %cst_65 {dimension_numbers = #tpu.dot_dimension_numbers<[1], [0], [0], [1], [0, 0, 1, 1], [], []>} : vector<16x128xbf16>, vector<128x384xbf16>, vector<16x384xf32> -> vector<16x384xf32>
      %295 = vector.extract_strided_slice %292 {offsets = [0, 0], sizes = [16, 128], strides = [1, 1]} : vector<16x384xf32> to vector<16x128xf32>
      %296 = vector.extract_strided_slice %294 {offsets = [0, 0], sizes = [16, 128], strides = [1, 1]} : vector<16x384xf32> to vector<16x128xf32>
      %297 = arith.addf %295, %296 : vector<16x128xf32>
      %298 = arith.negf %297 : vector<16x128xf32>
      %299 = math.exp %298 : vector<16x128xf32>
      %cst_66 = arith.constant 1.000000e+00 : f32
      %300 = vector.broadcast %cst_66 : f32 to vector<16x128xf32>
      %301 = arith.addf %300, %299 : vector<16x128xf32>
      %302 = arith.divf %300, %301 : vector<16x128xf32>
      %303 = vector.extract_strided_slice %292 {offsets = [0, 128], sizes = [16, 128], strides = [1, 1]} : vector<16x384xf32> to vector<16x128xf32>
      %304 = vector.extract_strided_slice %294 {offsets = [0, 128], sizes = [16, 128], strides = [1, 1]} : vector<16x384xf32> to vector<16x128xf32>
      %305 = arith.addf %303, %304 : vector<16x128xf32>
      %306 = arith.negf %305 : vector<16x128xf32>
      %307 = math.exp %306 : vector<16x128xf32>
      %cst_67 = arith.constant 1.000000e+00 : f32
      %308 = vector.broadcast %cst_67 : f32 to vector<16x128xf32>
      %309 = arith.addf %308, %307 : vector<16x128xf32>
      %310 = arith.divf %308, %309 : vector<16x128xf32>
      %311 = vector.extract_strided_slice %292 {offsets = [0, 256], sizes = [16, 128], strides = [1, 1]} : vector<16x384xf32> to vector<16x128xf32>
      %312 = vector.extract_strided_slice %294 {offsets = [0, 256], sizes = [16, 128], strides = [1, 1]} : vector<16x384xf32> to vector<16x128xf32>
      %313 = arith.addf %312, %20 : vector<16x128xf32>
      %314 = arith.mulf %302, %313 : vector<16x128xf32>
      %315 = arith.addf %311, %314 : vector<16x128xf32>
      %316 = math.tanh %315 : vector<16x128xf32>
      %cst_68 = arith.constant 1.000000e+00 : f32
      %317 = vector.broadcast %cst_68 : f32 to vector<16x128xf32>
      %318 = arith.subf %317, %310 : vector<16x128xf32>
      %319 = arith.mulf %318, %316 : vector<16x128xf32>
      %320 = arith.mulf %310, %289 : vector<16x128xf32>
      %321 = arith.addf %319, %320 : vector<16x128xf32>
      %322 = arith.addi %22, %c7_i32 : i32
      %323 = vector.broadcast %322 : i32 to vector<16x1xi32>
      %324 = arith.cmpi slt, %323, %21 : vector<16x1xi32>
      %325 = vector.shape_cast %324 : vector<16x1xi1> to vector<16x1xi1>
      %326 = vector.broadcast %325 : vector<16x1xi1> to vector<16x128xi1>
      %327 = arith.select %326, %321, %289 : vector<16x128xi1>, vector<16x128xf32>
      %c8_i32_69 = arith.constant 8 : i32
      %c0_70 = arith.constant 0 : index
      %c0_71 = arith.constant 0 : index
      %328 = vector.load %arg9[%c0_70, %c0_71] : memref<16x128xf32, #tpu.memory_space<vmem>>, vector<16x128xf32>
      tpu.vector_store %arg9[%c0_70, %c0_71], %327 {strides = array<i32>} : memref<16x128xf32, #tpu.memory_space<vmem>>, vector<16x128xf32>,
    } else {
    }
    return
  }
  func.func @transform_0(%arg0: i32, %arg1: i32, %arg2: memref<1xi32, #tpu.memory_space<smem>>) -> (i32, i32, i32) {
    %c0 = arith.constant 0 : index
    %0 = memref.load %arg2[%c0] : memref<1xi32, #tpu.memory_space<smem>>
    %c1_i32 = arith.constant 1 : i32
    %1 = arith.subi %0, %c1_i32 : i32
    %2 = arith.minsi %arg1, %1 : i32
    %c0_i32 = arith.constant 0 : i32
    %c0_i32_0 = arith.constant 0 : i32
    return %2, %arg0, %c0_i32 : i32, i32, i32
  }
  func.func @transform_1(%arg0: i32, %arg1: i32, %arg2: memref<1xi32, #tpu.memory_space<smem>>) -> (i32, i32) {
    %c0_i32 = arith.constant 0 : i32
    %c0_i32_0 = arith.constant 0 : i32
    return %arg0, %c0_i32 : i32, i32
  }
  func.func @transform_2(%arg0: i32, %arg1: i32, %arg2: memref<1xi32, #tpu.memory_space<smem>>) -> (i32, i32) {
    %c0_i32 = arith.constant 0 : i32
    %c0_i32_0 = arith.constant 0 : i32
    %c0_i32_1 = arith.constant 0 : i32
    return %c0_i32, %c0_i32_0 : i32, i32
  }
  func.func @transform_3(%arg0: i32, %arg1: i32, %arg2: memref<1xi32, #tpu.memory_space<smem>>) -> (i32, i32) {
    %c0_i32 = arith.constant 0 : i32
    %c0_i32_0 = arith.constant 0 : i32
    %c0_i32_1 = arith.constant 0 : i32
    return %c0_i32, %c0_i32_0 : i32, i32
  }
  func.func @transform_4(%arg0: i32, %arg1: i32, %arg2: memref<1xi32, #tpu.memory_space<smem>>) -> (i32, i32) {
    %c0_i32 = arith.constant 0 : i32
    %c0_i32_0 = arith.constant 0 : i32
    %c0_i32_1 = arith.constant 0 : i32
    return %c0_i32, %c0_i32_0 : i32, i32
  }
  func.func @transform_5(%arg0: i32, %arg1: i32, %arg2: memref<1xi32, #tpu.memory_space<smem>>) -> (i32, i32) {
    %c0_i32 = arith.constant 0 : i32
    %c0_i32_0 = arith.constant 0 : i32
    %c0_i32_1 = arith.constant 0 : i32
    return %c0_i32, %c0_i32_0 : i32, i32
  }
  func.func @transform_6(%arg0: i32, %arg1: i32, %arg2: memref<1xi32, #tpu.memory_space<smem>>) -> (i32, i32) {
    %c0_i32 = arith.constant 0 : i32
    %c0_i32_0 = arith.constant 0 : i32
    return %arg0, %c0_i32 : i32, i32
  }
}

</mosaic_0001>

<bundles_post_ra>
// kernel: gru_forward.3
= control target key start
LH: loop header
LB: loop body
LE: loop exit
PB: predicated region body
PF: predicated region fallthrough
CT: control target
= control target key end

     0   :  { %v418_v1 = vmov 0   ;;  %v51_v34 = vlaneseq  ;;  %s565_s1 = inlined_call_operand.vmem [shape: bf16[128,512], index: 1, kind: input, shape index: {}]   ;;  %s566_s0 = inlined_call_operand.vmem [shape: bf16[16,128], index: 0, kind: input, shape index: {}]   ;;  %s567_s2 = inlined_call_operand.vmem [shape: f32[1,512], index: 2, kind: input, shape index: {}]   ;;  %s568_s3 = inlined_call_operand.vmem [shape: f32[16,512], index: 3, kind: output, shape index: {}]  }
   0x1   :  { %v369_v0 = vld [vmem:[%s565_s1 + $0x4] ss:$16 sps:$4 sm:$0xff]   ;;  %269 = vmatprep.mubr.bf16.mxu0 %v418_v1  ;;  %312 = vmatprep.mubr.bf16.mxu1 %v418_v1  ;;  %v371_v2 = vld [vmem:[%s565_s1 + $0xc] ss:$16 sps:$4 sm:$0xff]   ;;  %v373_v3 = vld [vmem:[%s565_s1] ss:$16 sps:$4 sm:$0xff]  }
   0x2   :  { %237 = vmatprep.subr.bf16.mxu0 %v369_v0  ;;  %v374_v4 = vld [vmem:[%s565_s1 + $0x8] ss:$16 sps:$4 sm:$0xff]   ;;  %280 = vmatprep.subr.bf16.mxu1 %v371_v2  ;;  %v375_v5 = vld [vmem:[%s565_s1 + $0x24] ss:$16 sps:$4 sm:$0xff]   ;;  %v377_v6 = vld [vmem:[%s565_s1 + $0x2c] ss:$16 sps:$4 sm:$0xff]  }
   0x3   :  { %238 = vmatpush1.bf16.msra.mxu0 %v373_v3  ;;  %281 = vmatpush1.bf16.msra.mxu1 %v374_v4  ;;  %v379_v7 = vld [vmem:[%s565_s1 + $0x20] ss:$16 sps:$4 sm:$0xff]   ;;  %v380_v8 = vld [vmem:[%s565_s1 + $0x28] ss:$16 sps:$4 sm:$0xff]   ;;  %v381_v9 = vld [vmem:[%s565_s1 + $0x44] ss:$16 sps:$4 sm:$0xff]  }
   0x4   :  { %239 = vmatprep.subr.bf16.mxu0 %v375_v5  ;;  %282 = vmatprep.subr.bf16.mxu1 %v377_v6  ;;  %v383_v10 = vld [vmem:[%s565_s1 + $0x4c] ss:$16 sps:$4 sm:$0xff]   ;;  %v385_v11 = vld [vmem:[%s565_s1 + $0x40] ss:$16 sps:$4 sm:$0xff]   ;;  %v386_v12 = vld [vmem:[%s565_s1 + $0x48] ss:$16 sps:$4 sm:$0xff]  }
   0x5   :  { %v387_v13 = vld [vmem:[%s565_s1 + $0x64] ss:$16 sps:$4 sm:$0xff]   ;;  %v389_v14 = vld [vmem:[%s565_s1 + $0x6c] ss:$16 sps:$4 sm:$0xff]   ;;  %v391_v15 = vld [vmem:[%s565_s1 + $0x60] ss:$16 sps:$4 sm:$0xff]  }
   0x6   :  { %v392_v16 = vld [vmem:[%s565_s1 + $0x68] ss:$16 sps:$4 sm:$0xff]   ;;  %v393_v17 = vld [vmem:[%s565_s1 + $0x84] ss:$16 sps:$4 sm:$0xff]   ;;  %v395_v18 = vld [vmem:[%s565_s1 + $0x8c] ss:$16 sps:$4 sm:$0xff]  }
   0x7   :  { %240 = vmatpush1.bf16.msra.mxu0 %v379_v7  ;;  %283 = vmatpush1.bf16.msra.mxu1 %v380_v8  ;;  %v397_v19 = vld [vmem:[%s565_s1 + $0x80] ss:$16 sps:$4 sm:$0xff]   ;;  %v398_v20 = vld [vmem:[%s565_s1 + $0x88] ss:$16 sps:$4 sm:$0xff]   ;;  %v399_v21 = vld [vmem:[%s565_s1 + $0xa4] ss:$16 sps:$4 sm:$0xff]  }
   0x8   :  { %241 = vmatprep.subr.bf16.mxu0 %v381_v9  ;;  %284 = vmatprep.subr.bf16.mxu1 %v383_v10  ;;  %v401_v22 = vld [vmem:[%s565_s1 + $0xac] ss:$16 sps:$4 sm:$0xff]   ;;  %v403_v23 = vld [vmem:[%s565_s1 + $0xa0] ss:$16 sps:$4 sm:$0xff]   ;;  %v404_v24 = vld [vmem:[%s565_s1 + $0xa8] ss:$16 sps:$4 sm:$0xff]  }
   0x9   :  { %v405_v25 = vld [vmem:[%s565_s1 + $0xc4] ss:$16 sps:$4 sm:$0xff]   ;;  %v407_v26 = vld [vmem:[%s565_s1 + $0xcc] ss:$16 sps:$4 sm:$0xff]   ;;  %v409_v27 = vld [vmem:[%s565_s1 + $0xc0] ss:$16 sps:$4 sm:$0xff]  }
   0xa   :  { %v410_v28 = vld [vmem:[%s565_s1 + $0xc8] ss:$16 sps:$4 sm:$0xff]   ;;  %v411_v29 = vld [vmem:[%s565_s1 + $0xe4] ss:$16 sps:$4 sm:$0xff]   ;;  %v413_v30 = vld [vmem:[%s565_s1 + $0xec] ss:$16 sps:$4 sm:$0xff]  }
   0xb   :  { %242 = vmatpush1.bf16.msra.mxu0 %v385_v11  ;;  %285 = vmatpush1.bf16.msra.mxu1 %v386_v12  ;;  %v415_v31 = vld [vmem:[%s565_s1 + $0xe0] ss:$16 sps:$4 sm:$0xff]   ;;  %v416_v32 = vld [vmem:[%s565_s1 + $0xe8] ss:$16 sps:$4 sm:$0xff]   ;;  %v52_v35 = vshrl.u32 %v51_v34, 7 }
   0xc   :  { %243 = vmatprep.subr.bf16.mxu0 %v387_v13  ;;  %286 = vmatprep.subr.bf16.mxu1 %v389_v14  ;;  %v417_v33 = vld [vmem:[%s566_s0] sm:$0xff]  }
   0xd   :  { %v53_v36 = vsub.s32 0, %v52_v35  ;;  %v61_v37 = vsub.s32 2, %v52_v35  ;;  %v49_v38 = vld [vmem:[%s567_s2] sm:$0xf]  ;;  %v57_v39 = vsub.s32 1, %v52_v35  ;;  %v65_v40 = vsub.s32 3, %v52_v35 }
   0xf   :  { %244 = vmatpush1.bf16.msra.mxu0 %v391_v15  ;;  %287 = vmatpush1.bf16.msra.mxu1 %v392_v16  ;;  %v54_v41 = vrot.slane %v49_v38, %v53_v36  ;;  %v62_v42 = vrot.slane %v49_v38, %v61_v37  ;;  %v58_v43 = vrot.slane %v49_v38, %v57_v39 }
  0x10   :  { %245 = vmatprep.subr.bf16.mxu0 %v393_v17  ;;  %288 = vmatprep.subr.bf16.mxu1 %v395_v18  ;;  %v66_v44 = vrot.slane %v49_v38, %v65_v40 }
  0x13   :  { %246 = vmatpush1.bf16.msra.mxu0 %v397_v19  ;;  %289 = vmatpush1.bf16.msra.mxu1 %v398_v20 }
  0x14   :  { %247 = vmatprep.subr.bf16.mxu0 %v399_v21  ;;  %290 = vmatprep.subr.bf16.mxu1 %v401_v22 }
  0x17   :  { %248 = vmatpush1.bf16.msra.mxu0 %v403_v23  ;;  %291 = vmatpush1.bf16.msra.mxu1 %v404_v24 }
  0x18   :  { %249 = vmatprep.subr.bf16.mxu0 %v405_v25  ;;  %292 = vmatprep.subr.bf16.mxu1 %v407_v26 }
  0x1b   :  { %250 = vmatpush1.bf16.msra.mxu0 %v409_v27  ;;  %293 = vmatpush1.bf16.msra.mxu1 %v410_v28 }
  0x1c   :  { %251 = vmatprep.subr.bf16.mxu0 %v411_v29  ;;  %294 = vmatprep.subr.bf16.mxu1 %v413_v30 }
  0x1f   :  { %252 = vmatpush1.bf16.msra.mxu0 %v415_v31  ;;  %295 = vmatpush1.bf16.msra.mxu1 %v416_v32 }
  0x22   :  { %270 = vmatmul.mubr.bf16.vlgmr.msra.gmra.mrb[0].mxu0 %v417_v33  ;;  %313 = vmatmul.mubr.bf16.vlgmr.msra.gmra.mrb[0].mxu1 %v417_v33 }
  0xf5   :  { %v271_v45 = vpop.f32.mrb[0].mxu0  ;;  %v314_v46 = vpop.f32.mrb[0].mxu1 }
  0xf6   :  { %v272_v47 = vadd.f32 %v271_v45, %v54_v41  ;;  %v315_v48 = vadd.f32 %v314_v46, %v62_v42  ;;  %v273_v49 = vpop.f32.mrb[1].mxu0  ;;  %v316_v50 = vpop.f32.mrb[1].mxu1 }
  0xf7   :  { %v274_v51 = vadd.f32 %v273_v49, %v58_v43  ;;  %v317_v52 = vadd.f32 %v316_v50, %v66_v44  ;;  %v275_v53 = vpop.f32.mrb[2].mxu0  ;;  %v318_v54 = vpop.f32.mrb[2].mxu1 }
  0xf8   :  { %323 = vst [vmem:[%s568_s3] sm:$0xff] %v272_v47  ;;  %325 = vst [vmem:[%s568_s3 + $0x10] sm:$0xff] %v315_v48  ;;  %v276_v55 = vadd.f32 %v275_v53, %v54_v41  ;;  %v319_v56 = vadd.f32 %v318_v54, %v62_v42  ;;  %v277_v57 = vpop.f32.mrb[3].mxu0  ;;  %v320_v58 = vpop.f32.mrb[3].mxu1 }
  0xf9   :  { %324 = vst [vmem:[%s568_s3 + $0x8] sm:$0xff] %v274_v51  ;;  %326 = vst [vmem:[%s568_s3 + $0x18] sm:$0xff] %v317_v52  ;;  %v278_v59 = vadd.f32 %v277_v57, %v58_v43  ;;  %v321_v60 = vadd.f32 %v320_v58, %v66_v44 }
  0xfa   :  { %327 = vst [vmem:[%s568_s3 + $0x20] sm:$0xff] %v276_v55  ;;  %329 = vst [vmem:[%s568_s3 + $0x30] sm:$0xff] %v319_v56 }
  0xfb   :  { %328 = vst [vmem:[%s568_s3 + $0x28] sm:$0xff] %v278_v59  ;;  %330 = vst [vmem:[%s568_s3 + $0x38] sm:$0xff] %v321_v60 }

// kernel: gru_forward.2
= control target key start
LH: loop header
LB: loop body
LE: loop exit
PB: predicated region body
PF: predicated region fallthrough
CT: control target
= control target key end

     0   :  { %v2694_v0 = vmov 0.0   ;;  %s3625_s0 = inlined_call_operand.<no memory space> [shape: s32[1], index: 0, kind: input, shape index: {}]   ;;  %s3626_s2 = inlined_call_operand.vmem [shape: s32[16,1], index: 2, kind: input, shape index: {}]   ;;  %s3627_s3 = inlined_call_operand.vmem [shape: bf16[128,384], index: 3, kind: input, shape index: {}]   ;;  %s3628_s4 = inlined_call_operand.vmem [shape: bf16[128,384], index: 4, kind: input, shape index: {}]   ;;  %s3629_s5 = inlined_call_operand.vmem [shape: f32[1,384], index: 5, kind: input, shape index: {}]   ;;  %s3630_s6 = inlined_call_operand.vmem [shape: f32[1,128], index: 6, kind: input, shape index: {}]   ;;  %s3631_s7 = inlined_call_operand.vmem [shape: f32[16,128], index: 7, kind: output, shape index: {}]   ;;  %s3632_s1 = inlined_call_operand.vmem [shape: bf16[8,16,128], index: 1, kind: input, shape index: {}]  }
   0x1   :  { %s1974_s26 = sadd.s32 4294967295, %s3625_s0  ;;  %70 = vst [vmem:[%s3631_s7] sm:$0xff] %v2694_v0  ;;  %71 = vst [vmem:[%s3631_s7 + $0x8] sm:$0xff] %v2694_v0  ;;  %p1980_p2 = scmp.le.s32.totalorder %s3625_s0, 0 }
   0x2   :  { %p1975_p0 = scmp.gt.s32.totalorder %s1974_s26, 0 }
   0x4   :  { %s3642_s26 = smov (%p1975_p0, %s1974_s26), 0  ;;  %76 = sbr.rel (%p1980_p2) target bundleno = 2220 (0x8ac), region = 33 }
   0x5   :  { %s1976_s8 = sshll.u32 %s3642_s26, 3 }
   0x6   :  { %p55_p1 = scmp.lt.s32.totalorder %s1976_s8, 7 }
   0x8   :  { %s3644_s8 = smov (!%p55_p1, %s1976_s8), 7 }
   0x9   :  { %s2086_s9 = sshll.u32 %s3644_s8, 3 }
   0xa   :  { %s2750_s12 = scalar_lea.vmem %s3632_s1, %s2086_s9 }
   0xb   :  { %v2437_v1 = vld [vmem:[%s3627_s3 + $0x4] ss:$12 sps:$4 sm:$0xff]   ;;  %v2439_v2 = vld [vmem:[%s3627_s3] ss:$12 sps:$4 sm:$0xff]   ;;  %v3633_v3 = vmov 0   ;;  %v3635_v47 = vmov 0.0  }
   0xc   :  { %350 = vmatprep.mubr.bf16.mxu0 %v3633_v3  ;;  %2435 = vset.pattern.permute.xlu0 %v3633_v3  ;;  %v2440_v4 = vld [vmem:[%s3627_s3 + $0x1c] ss:$12 sps:$4 sm:$0xff]   ;;  %v2442_v5 = vld [vmem:[%s3627_s3 + $0x18] ss:$12 sps:$4 sm:$0xff]   ;;  %v2443_v6 = vld [vmem:[%s3627_s3 + $0x34] ss:$12 sps:$4 sm:$0xff]  }
   0xd   :  { %318 = vmatprep.subr.bf16.mxu0 %v2437_v1  ;;  %2436 = vset.pattern.permute.xlu1 %v3633_v3  ;;  %v2445_v7 = vld [vmem:[%s3627_s3 + $0x30] ss:$12 sps:$4 sm:$0xff]   ;;  %v2446_v8 = vld [vmem:[%s3627_s3 + $0x4c] ss:$12 sps:$4 sm:$0xff]   ;;  %v2448_v9 = vld [vmem:[%s3627_s3 + $0x48] ss:$12 sps:$4 sm:$0xff]  }
   0xe   :  { %319 = vmatpush1.bf16.msra.mxu0 %v2439_v2  ;;  %v2461_v10 = vld [vmem:[%s2750_s12] sm:$0xff]   ;;  %v2452_v13 = vld [vmem:[%s3627_s3 + $0x7c] ss:$12 sps:$4 sm:$0xff]   ;;  %v2458_v20 = vld [vmem:[%s3627_s3 + $0xac] ss:$12 sps:$4 sm:$0xff]   ;;  %vm2697_vm8 = vmmov 0  }
   0xf   :  { %320 = vmatprep.subr.bf16.mxu0 %v2440_v4  ;;  %v2449_v11 = vld [vmem:[%s3627_s3 + $0x64] ss:$12 sps:$4 sm:$0xff]   ;;  %2191 = vmatprep.mubr.bf16.mxu1 %v2461_v10  ;;  %v2451_v12 = vld [vmem:[%s3627_s3 + $0x60] ss:$12 sps:$4 sm:$0xff]   ;;  %v2474_v15 = vld [vmem:[%s3627_s3 + $0x8] ss:$12 sps:$4 sm:$0xff]  }
  0x10   :  { %v2454_v14 = vld [vmem:[%s3627_s3 + $0x78] ss:$12 sps:$4 sm:$0xff]   ;;  %v2455_v16 = vld [vmem:[%s3627_s3 + $0x94] ss:$12 sps:$4 sm:$0xff]   ;;  %2175 = vmatprep.subr.bf16.mxu1 %v2474_v15  ;;  %v2457_v18 = vld [vmem:[%s3627_s3 + $0x90] ss:$12 sps:$4 sm:$0xff]  }
  0x11   :  { %v2478_v17 = vld [vmem:[%s3627_s3 + $0x20] ss:$12 sps:$4 sm:$0xff]   ;;  %2176 = vmatpush3.bf16.msra.mxu1 %v2474_v15  ;;  %v2480_v19 = vld [vmem:[%s3627_s3 + $0x38] ss:$12 sps:$4 sm:$0xff]   ;;  %v2460_v21 = vld [vmem:[%s3627_s3 + $0xa8] ss:$12 sps:$4 sm:$0xff]  }
  0x12   :  { %321 = vmatpush1.bf16.msra.mxu0 %v2442_v5  ;;  %2177 = vmatprep.subr.bf16.mxu1 %v2478_v17  ;;  %v2484_v22 = vld [vmem:[%s3627_s3 + $0x50] ss:$12 sps:$4 sm:$0xff]   ;;  %v2827_v24 = vld [vmem:[%s3628_s4] ss:$12 sps:$4 sm:$0xff]   ;;  %v2486_v26 = vld [vmem:[%s3627_s3 + $0x68] ss:$12 sps:$4 sm:$0xff]  }
  0x13   :  { %322 = vmatprep.subr.bf16.mxu0 %v2443_v6  ;;  %v2822_v23 = vld [vmem:[%s3628_s4 + $0x4] ss:$12 sps:$4 sm:$0xff]   ;;  %v2832_v25 = vld [vmem:[%s3628_s4 + $0x1c] ss:$12 sps:$4 sm:$0xff]   ;;  %v2490_v28 = vld [vmem:[%s3627_s3 + $0x80] ss:$12 sps:$4 sm:$0xff]  }
  0x14   :  { %v2841_v27 = vld [vmem:[%s3628_s4 + $0x18] ss:$12 sps:$4 sm:$0xff]   ;;  %v2852_v29 = vld [vmem:[%s3628_s4 + $0x34] ss:$12 sps:$4 sm:$0xff]   ;;  %v2465_v30 = vld [vmem:[%s2750_s12 + $0x8] sm:$0xff]  }
  0x15   :  { %2178 = vmatpush3.bf16.msra.mxu1 %v2478_v17  ;;  %v2859_v31 = vld [vmem:[%s3628_s4 + $0x30] ss:$12 sps:$4 sm:$0xff]   ;;  %v2864_v32 = vld [vmem:[%s3628_s4 + $0x4c] ss:$12 sps:$4 sm:$0xff]   ;;  %v2873_v34 = vld [vmem:[%s3628_s4 + $0x48] ss:$12 sps:$4 sm:$0xff]  }
  0x16   :  { %323 = vmatpush1.bf16.msra.mxu0 %v2445_v7  ;;  %2179 = vmatprep.subr.bf16.mxu1 %v2480_v19  ;;  %v2492_v33 = vld [vmem:[%s3627_s3 + $0x98] ss:$12 sps:$4 sm:$0xff]   ;;  %v2496_v35 = vld [vmem:[%s3627_s3 + $0xb0] ss:$12 sps:$4 sm:$0xff]   ;;  %v2895_v39 = vld [vmem:[%s3626_s2 + $0x8] sm:$0xff] }
  0x17   :  { %324 = vmatprep.subr.bf16.mxu0 %v2446_v8  ;;  %v2884_v36 = vld [vmem:[%s3628_s4 + $0x64] ss:$12 sps:$4 sm:$0xff]   ;;  %v2901_v40 = vld [vmem:[%s3628_s4 + $0x60] ss:$12 sps:$4 sm:$0xff]   ;;  %vm2043_vm1 = vcmp.gt.s32.totalorder %v2895_v39, 0  ;;  %v2473_v48 = vld [vmem:[%s2750_s12 + $0x18] sm:$0xff]  }
  0x18   :  { %v2469_v37 = vld [vmem:[%s2750_s12 + $0x10] sm:$0xff]   ;;  %v2890_v38 = vld [vmem:[%s3626_s2] sm:$0xff]  ;;  %v2909_v41 = vld [vmem:[%s3628_s4 + $0x7c] ss:$12 sps:$4 sm:$0xff]   ;;  %v887_v44 = vsel %vm2043_vm1, 1, %v3633_v3  ;;  %vm2049_vm10 = vcmp.gt.s32.totalorder %v2895_v39, 1 }
  0x19   :  { %2180 = vmatpush3.bf16.msra.mxu1 %v2480_v19  ;;  %vm2042_vm0 = vcmp.gt.s32.totalorder %v2890_v38, 0  ;;  %v2915_v43 = vld [vmem:[%s3628_s4 + $0x8] ss:$12 sps:$4 sm:$0xff]   ;;  %v2923_v45 = vld [vmem:[%s3628_s4 + $0x78] ss:$12 sps:$4 sm:$0xff]   ;;  %vm2054_vm2 = vcmp.gt.s32.totalorder %v2890_v38, 2 }
  0x1a   :  { %325 = vmatpush1.bf16.msra.mxu0 %v2448_v9  ;;  %2181 = vmatprep.subr.bf16.mxu1 %v2484_v22  ;;  %v886_v42 = vsel %vm2042_vm0, 1, %v3633_v3  ;;  %v2930_v46 = vld [vmem:[%s3628_s4 + $0x94] ss:$12 sps:$4 sm:$0xff]   ;;  %v1190_v50 = vsel %vm2054_vm2, 1, %v3633_v3  ;;  %v2945_v51 = vld [vmem:[%s3628_s4 + $0x90] ss:$12 sps:$4 sm:$0xff]  }
  0x1b   :  { %326 = vmatprep.subr.bf16.mxu0 %v2449_v11  ;;  %889 = vperm.xlu0 %2435, %v886_v42   ;;  %v2938_v49 = vld [vmem:[%s3628_s4 + $0x20] ss:$12 sps:$4 sm:$0xff]   ;;  %vm2060_vm3 = vcmp.gt.s32.totalorder %v2890_v38, 3  ;;  %v2959_v53 = vld [vmem:[%s3628_s4 + $0x38] ss:$12 sps:$4 sm:$0xff]   ;;  %vm2066_vm4 = vcmp.gt.s32.totalorder %v2890_v38, 4 }
  0x1c   :  { %v2953_v52 = vld [vmem:[%s3628_s4 + $0xac] ss:$12 sps:$4 sm:$0xff]   ;;  %v1342_v54 = vsel %vm2060_vm3, 1, %v3633_v3  ;;  %v2967_v55 = vld [vmem:[%s3628_s4 + $0xa8] ss:$12 sps:$4 sm:$0xff]   ;;  %v2479_v56 = vld [vmem:[%s2750_s12 + $0x20] sm:$0xff]  }
  0x1d   :  { %2182 = vmatpush3.bf16.msra.mxu1 %v2484_v22  ;;  %v2977_v57 = vld [vmem:[%s3628_s4 + $0x50] ss:$12 sps:$4 sm:$0xff]   ;;  %v1494_v58 = vsel %vm2066_vm4, 1, %v3633_v3  ;;  %vm2072_vm5 = vcmp.gt.s32.totalorder %v2890_v38, 5  ;;  %v2988_v59 = vld [vmem:[%s3628_s4 + $0x68] ss:$12 sps:$4 sm:$0xff]  }
  0x1e   :  { %327 = vmatpush1.bf16.msra.mxu0 %v2451_v12  ;;  %2183 = vmatprep.subr.bf16.mxu1 %v2486_v26  ;;  %v1646_v60 = vsel %vm2072_vm5, 1, %v3633_v3  ;;  %v2485_v61 = vld [vmem:[%s2750_s12 + $0x28] sm:$0xff]   ;;  %vm2078_vm6 = vcmp.gt.s32.totalorder %v2890_v38, 6  ;;  %v2491_v62 = vld [vmem:[%s2750_s12 + $0x30] sm:$0xff]   ;;  %vm2084_vm7 = vcmp.gt.s32.totalorder %v2890_v38, 7  ;;  %v2497_v4 = vld [vmem:[%s2750_s12 + $0x38] sm:$0xff]  }
  0x1f   :  { %328 = vmatprep.subr.bf16.mxu0 %v2452_v13  ;;  %892 = vperm.xlu0 %2435, %v887_v44   ;;  %v3000_v63 = vld [vmem:[%s3628_s4 + $0x80] ss:$12 sps:$4 sm:$0xff]   ;;  %v1798_v0 = vsel %vm2078_vm6, 1, %v3633_v3  ;;  %v3009_v1 = vld [vmem:[%s3628_s4 + $0x98] ss:$12 sps:$4 sm:$0xff]   ;;  %v1950_v2 = vsel %vm2084_vm7, 1, %v3633_v3  ;;  %v127_v13 = vlaneseq }
  0x20   :  { %v3019_v5 = vld [vmem:[%s3628_s4 + $0xb0] ss:$12 sps:$4 sm:$0xff]   ;;  %v3027_v6 = vld [vmem:[%s3631_s7] sm:$0xff]  ;;  %v3032_v7 = vld [vmem:[%s3631_s7 + $0x8] sm:$0xff]  ;;  %vm2048_vm9 = vcmp.gt.s32.totalorder %v2890_v38, 1  ;;  %vm2055_vm11 = vcmp.gt.s32.totalorder %v2895_v39, 2 }
  0x21   :  { %2184 = vmatpush3.bf16.msra.mxu1 %v2486_v26  ;;  %v626_v8 = vpack.c.bf16 %v3032_v7, %v3027_v6  ;;  %v1038_v9 = vsel %vm2048_vm9, 1, %v3633_v3  ;;  %v1191_v11 = vsel %vm2055_vm11, 1, %v3633_v3  ;;  %vm2061_vm12 = vcmp.gt.s32.totalorder %v2895_v39, 3  ;;  %v125_v19 = vld [vmem:[%s3629_s5] sm:$0x7] }
  0x22   :  { %329 = vmatpush1.bf16.msra.mxu0 %v2454_v14  ;;  %2185 = vmatprep.subr.bf16.mxu1 %v2490_v28  ;;  %v1343_v12 = vsel %vm2061_vm12, 1, %v3633_v3  ;;  %vm2067_vm13 = vcmp.gt.s32.totalorder %v2895_v39, 4  ;;  %vm2073_vm14 = vcmp.gt.s32.totalorder %v2895_v39, 5  ;;  %v128_v15 = vshrl.u32 %v127_v13, 7 }
  0x23   :  { %330 = vmatprep.subr.bf16.mxu0 %v2455_v16  ;;  %1193 = vperm.xlu0 %2435, %v1190_v50   ;;  %v1495_v14 = vsel %vm2067_vm13, 1, %v3633_v3  ;;  %v1647_v16 = vsel %vm2073_vm14, 1, %v3633_v3  ;;  %vm2079_vm15 = vcmp.gt.s32.totalorder %v2895_v39, 6  ;;  %vm2085_vm0 = vcmp.gt.s32.totalorder %v2895_v39, 7 }
  0x24   :  { %1041 = vperm.xlu1 %2436, %v1038_v9   ;;  %v137_v17 = vsub.s32 2, %v128_v15 }
  0x25   :  { %2186 = vmatpush3.bf16.msra.mxu1 %v2490_v28 }
  0x26   :  { %331 = vmatpush1.bf16.msra.mxu0 %v2457_v18  ;;  %2187 = vmatprep.subr.bf16.mxu1 %v2492_v33  ;;  %v1799_v18 = vsel %vm2079_vm15, 1, %v3633_v3 }
  0x27   :  { %332 = vmatprep.subr.bf16.mxu0 %v2458_v20  ;;  %1345 = vperm.xlu0 %2435, %v1342_v54   ;;  %v3093_v20 = vrot.slane %v125_v19, %v137_v17 }
  0x29   :  { %2188 = vmatpush3.bf16.msra.mxu1 %v2492_v33 }
  0x2a   :  { %333 = vmatpush1.bf16.msra.mxu0 %v2460_v21  ;;  %2189 = vmatprep.subr.bf16.mxu1 %v2496_v35  ;;  %v1951_v21 = vsel %vm2085_vm0, 1, %v3633_v3 }
  0x2b   :  { %755 = vmatprep.subr.bf16.mxu0 %v2822_v23  ;;  %1497 = vperm.xlu0 %2435, %v1494_v58  }
  0x2d   :  { %351 = vmatmul.mubr.bf16.vlgmr.msra.gmra.mrb[0].mxu0 %v2461_v10  ;;  %2190 = vmatpush3.bf16.msra.mxu1 %v2496_v35  ;;  %v1039_v10 = vsel %vm2049_vm10, 1, %v3633_v3 }
  0x2e   :  { %756 = vmatpush1.bf16.msra.mxu0 %v2827_v24  ;;  %360 = vmatprep.mubr.bf16.mxu0 %v3633_v3 }
  0x2f   :  { %757 = vmatprep.subr.bf16.mxu0 %v2832_v25  ;;  %2207 = vmatprep.subr.bf16.mxu1 %v3635_v47 }
  0x30   :  { %2192 = vmatmul.mubr.bf16.vlgmr.msra.gmra.mrb[0].mxu1 %v2465_v30  ;;  %1649 = vperm.xlu0 %2435, %v1646_v60  }
  0x31   :  { %2208 = vmatpush3.bf16.msra.mxu1 %v2915_v43  ;;  %2195 = vmatprep.mubr.bf16.mxu1 %v2469_v37 }
  0x32   :  { %758 = vmatpush1.bf16.msra.mxu0 %v2841_v27  ;;  %2209 = vmatprep.subr.bf16.mxu1 %v3635_v47 }
  0x33   :  { %759 = vmatprep.subr.bf16.mxu0 %v2852_v29  ;;  %1044 = vperm.xlu1 %2436, %v1039_v10  }
  0x34   :  { %1801 = vperm.xlu0 %2435, %v1798_v0  }
  0x35   :  { %361 = vmatmul.mubr.bf16.gmra.mrb[4].mxu0 %v2465_v30  ;;  %2210 = vmatpush3.bf16.msra.mxu1 %v2938_v49 }
  0x36   :  { %370 = vmatprep.mubr.bf16.mxu0 %v3633_v3  ;;  %760 = vmatpush1.bf16.msra.mxu0 %v2859_v31 }
  0x37   :  { %761 = vmatprep.subr.bf16.mxu0 %v2864_v32  ;;  %2211 = vmatprep.subr.bf16.mxu1 %v3635_v47 }
  0x38   :  { %2196 = vmatmul.mubr.bf16.gmra.mrb[4].mxu1 %v2473_v48  ;;  %1953 = vperm.xlu0 %2435, %v1950_v2  }
  0x39   :  { %2212 = vmatpush3.bf16.msra.mxu1 %v2959_v53  ;;  %2199 = vmatprep.mubr.bf16.mxu1 %v2479_v56 }
  0x3a   :  { %762 = vmatpush1.bf16.msra.mxu0 %v2873_v34  ;;  %2213 = vmatprep.subr.bf16.mxu1 %v3635_v47 }
  0x3b   :  { %763 = vmatprep.subr.bf16.mxu0 %v2884_v36  ;;  %1196 = vperm.xlu1 %2436, %v1191_v11  }
  0x3d   :  { %371 = vmatmul.mubr.bf16.gmra.mrb[8].mxu0 %v2469_v37  ;;  %2214 = vmatpush3.bf16.msra.mxu1 %v2977_v57 }
  0x3e   :  { %380 = vmatprep.mubr.bf16.mxu0 %v3633_v3  ;;  %764 = vmatpush1.bf16.msra.mxu0 %v2901_v40 }
  0x3f   :  { %765 = vmatprep.subr.bf16.mxu0 %v2909_v41  ;;  %2215 = vmatprep.subr.bf16.mxu1 %v3635_v47 }
  0x40   :  { %2200 = vmatmul.mubr.bf16.gmra.mrb[8].mxu1 %v2485_v61  ;;  %1348 = vperm.xlu1 %2436, %v1343_v12  }
  0x41   :  { %2216 = vmatpush3.bf16.msra.mxu1 %v2988_v59  ;;  %2203 = vmatprep.mubr.bf16.mxu1 %v2491_v62 }
  0x42   :  { %766 = vmatpush1.bf16.msra.mxu0 %v2923_v45  ;;  %2217 = vmatprep.subr.bf16.mxu1 %v3635_v47 }
  0x43   :  { %767 = vmatprep.subr.bf16.mxu0 %v2930_v46 }
  0x44   :  { %1500 = vperm.xlu1 %2436, %v1495_v14  }
  0x45   :  { %381 = vmatmul.mubr.bf16.gmra.mrb[12].mxu0 %v2473_v48  ;;  %2218 = vmatpush3.bf16.msra.mxu1 %v3000_v63 }
  0x46   :  { %390 = vmatprep.mubr.bf16.mxu0 %v3633_v3  ;;  %768 = vmatpush1.bf16.msra.mxu0 %v2945_v51 }
  0x47   :  { %769 = vmatprep.subr.bf16.mxu0 %v2953_v52  ;;  %2219 = vmatprep.subr.bf16.mxu1 %v3635_v47 }
  0x48   :  { %2204 = vmatmul.mubr.bf16.gmra.mrb[12].mxu1 %v2497_v4  ;;  %1652 = vperm.xlu1 %2436, %v1647_v16  }
  0x49   :  { %2220 = vmatpush3.bf16.msra.mxu1 %v3009_v1  ;;  %2223 = vmatprep.mubr.msk.bf16.mxu1 %vm2697_vm8, %v3635_v47 }
  0x4a   :  { %770 = vmatpush1.bf16.msra.mxu0 %v2967_v55  ;;  %2221 = vmatprep.subr.bf16.mxu1 %v3635_v47 }
  0x4b   :  { %906 = vmatprep.subr.bf16.mxu0 %v2822_v23 }
  0x4c   :  { %1804 = vperm.xlu1 %2436, %v1799_v18  }
  0x4d   :  { %391 = vmatmul.mubr.bf16.gmra.mrb[16].mxu0 %v2479_v56  ;;  %2222 = vmatpush3.bf16.msra.mxu1 %v3019_v5 }
  0x4e   :  { %400 = vmatprep.mubr.bf16.mxu0 %v3633_v3  ;;  %2227 = vmatprep.subr.bf16.mxu1 %v3635_v47 }
  0x50   :  { %2224 = vmatmul.mubr.bf16.vlgmr.msra.gmra.mrb[16].mxu1 %v626_v8  ;;  %1956 = vperm.xlu1 %2436, %v1951_v21  }
  0x51   :  { %2228 = vmatpush3.bf16.msra.mxu1 %v2915_v43  ;;  %2243 = vmatprep.mubr.msk.bf16.mxu1 %vm2697_vm8, %v3635_v47 }
  0x52   :  { %2229 = vmatprep.subr.bf16.mxu1 %v3635_v47 }
  0x55   :  { %401 = vmatmul.mubr.bf16.gmra.mrb[20].mxu0 %v2485_v61  ;;  %2230 = vmatpush3.bf16.msra.mxu1 %v2938_v49 }
  0x56   :  { %410 = vmatprep.mubr.bf16.mxu0 %v3633_v3  ;;  %2231 = vmatprep.subr.bf16.mxu1 %v3635_v47 }
  0x59   :  { %2232 = vmatpush3.bf16.msra.mxu1 %v2959_v53 }
  0x5a   :  { %2233 = vmatprep.subr.bf16.mxu1 %v3635_v47 }
  0x5d   :  { %411 = vmatmul.mubr.bf16.gmra.mrb[24].mxu0 %v2491_v62  ;;  %2234 = vmatpush3.bf16.msra.mxu1 %v2977_v57 }
  0x5e   :  { %420 = vmatprep.mubr.bf16.mxu0 %v3633_v3  ;;  %2235 = vmatprep.subr.bf16.mxu1 %v3635_v47 }
  0x61   :  { %2236 = vmatpush3.bf16.msra.mxu1 %v2988_v59 }
  0x62   :  { %2237 = vmatprep.subr.bf16.mxu1 %v3635_v47 }
  0x65   :  { %421 = vmatmul.mubr.bf16.gmra.mrb[28].mxu0 %v2497_v4  ;;  %2238 = vmatpush3.bf16.msra.mxu1 %v3000_v63 }
  0x66   :  { %787 = vmatprep.mubr.bf16.mxu0 %v3633_v3  ;;  %2239 = vmatprep.subr.bf16.mxu1 %v3635_v47 }
  0x69   :  { %2240 = vmatpush3.bf16.msra.mxu1 %v3009_v1 }
  0x6a   :  { %2241 = vmatprep.subr.bf16.mxu1 %v3635_v47 }
  0x6d   :  { %788 = vmatmul.mubr.bf16.vlgmr.msra.gmra.mrb[0].mxu0 %v626_v8  ;;  %2242 = vmatpush3.bf16.msra.mxu1 %v3019_v5 }
  0x6e   :  { %907 = vmatpush1.bf16.msra.mxu0 %v2827_v24  ;;  %938 = vmatprep.mubr.bf16.mxu0 %v3633_v3 }
  0x6f   :  { %908 = vmatprep.subr.bf16.mxu0 %v2832_v25  ;;  %2247 = vmatprep.subr.bf16.mxu1 %v3635_v47 }
  0x72   :  { %909 = vmatpush1.bf16.msra.mxu0 %v2841_v27 }
  0x73   :  { %910 = vmatprep.subr.bf16.mxu0 %v2852_v29 }
  0x76   :  { %911 = vmatpush1.bf16.msra.mxu0 %v2859_v31 }
  0x77   :  { %912 = vmatprep.subr.bf16.mxu0 %v2864_v32 }
  0x7a   :  { %913 = vmatpush1.bf16.msra.mxu0 %v2873_v34 }
  0x7b   :  { %914 = vmatprep.subr.bf16.mxu0 %v2884_v36 }
  0x7e   :  { %915 = vmatpush1.bf16.msra.mxu0 %v2901_v40 }
  0x7f   :  { %916 = vmatprep.subr.bf16.mxu0 %v2909_v41 }
  0x82   :  { %917 = vmatpush1.bf16.msra.mxu0 %v2923_v45 }
  0x83   :  { %918 = vmatprep.subr.bf16.mxu0 %v2930_v46 }
  0x86   :  { %919 = vmatpush1.bf16.msra.mxu0 %v2945_v51 }
  0x87   :  { %920 = vmatprep.subr.bf16.mxu0 %v2953_v52 }
  0x8a   :  { %921 = vmatpush1.bf16.msra.mxu0 %v2967_v55 }
  0x8b   :  { %1058 = vmatprep.subr.bf16.mxu0 %v2822_v23 }
  0x9a   :  { %v890_v3 = vpop.permute.xlu0 %889 }
  0x9b   :  { %vm894_vm1 = vcmp.eq.s32.totalorder %v890_v3, 1  ;;  %v3639_v3 = vmov 0  }
 0x103   :  { %v2193_v22 = vpop.f32.mrb[0].mxu1 }
 0x104   :  { %v3097_v26 = vadd.f32 %v2193_v22, %v3093_v20  ;;  %v3099_v28 = vpop.f32.mrb[1].mxu1 }
 0x105   :  { %v2194_v30 = vpop.f32.mrb[2].mxu1 }
 0x106   :  { %v3102_v33 = vadd.f32 %v2194_v30, %v3093_v20  ;;  %v3104_v35 = vpop.f32.mrb[3].mxu1  ;;  %v129_v30 = vsub.s32 0, %v128_v15 }
 0x10b   :  { %v2197_v37 = vpop.f32.mrb[4].mxu1 }
 0x10c   :  { %v3107_v38 = vadd.f32 %v2197_v37, %v3093_v20  ;;  %v481_v39 = vpop.f32.mrb[5].mxu1  ;;  %v133_v37 = vsub.s32 1, %v128_v15 }
 0x10d   :  { %v3110_v42 = vadd.f32 %v481_v39, %v3093_v20  ;;  %v2198_v44 = vpop.f32.mrb[6].mxu1  ;;  %v3142_v39 = vrot.slane %v125_v19, %v129_v30 }
 0x10e   :  { %v3113_v48 = vadd.f32 %v2198_v44, %v3093_v20  ;;  %v484_v50 = vpop.f32.mrb[7].mxu1 }
 0x10f   :  { %v3116_v54 = vadd.f32 %v484_v50, %v3093_v20  ;;  %v3144_v50 = vrot.slane %v125_v19, %v133_v37 }
 0x113   :  { %v2201_v56 = vpop.f32.mrb[8].mxu1 }
 0x114   :  { %v3119_v58 = vadd.f32 %v2201_v56, %v3093_v20  ;;  %v497_v60 = vpop.f32.mrb[9].mxu1 }
 0x115   :  { %v3122_v61 = vadd.f32 %v497_v60, %v3093_v20  ;;  %v2202_v62 = vpop.f32.mrb[10].mxu1 }
 0x116   :  { %v3125_v0 = vadd.f32 %v2202_v62, %v3093_v20  ;;  %v500_v2 = vpop.f32.mrb[11].mxu1 }
 0x117   :  { %v3128_v4 = vadd.f32 %v500_v2, %v3093_v20 }
 0x11b   :  { %v2205_v8 = vpop.f32.mrb[12].mxu1 }
 0x11c   :  { %v3131_v9 = vadd.f32 %v2205_v8, %v3093_v20  ;;  %v513_v10 = vpop.f32.mrb[13].mxu1 }
 0x11d   :  { %v3134_v11 = vadd.f32 %v513_v10, %v3093_v20  ;;  %v2206_v12 = vpop.f32.mrb[14].mxu1 }
 0x11e   :  { %v3137_v13 = vadd.f32 %v2206_v12, %v3093_v20  ;;  %v516_v14 = vpop.f32.mrb[15].mxu1 }
 0x11f   :  { %v3140_v16 = vadd.f32 %v516_v14, %v3093_v20 }
 0x120   :  { %3637 = vst [vmem:[#allocation5_spill] sm:$0xff] %v3137_v13 }
 0x123   :  { %v832_v17 = vpop.f32.mrb[16].mxu1 }
 0x124   :  { %v2225_v18 = vpop.f32.mrb[17].mxu1 }
 0x125   :  { %v835_v21 = vpop.f32.mrb[18].mxu1 }
 0x126   :  { %v2226_v22 = vpop.f32.mrb[19].mxu1 }
 0x140   :  { %v789_v44 = vpop.f32.mrb[0].mxu0 }
 0x141   :  { %v2367_v56 = vadd.f32 %v789_v44, %v3142_v39  ;;  %v791_v60 = vpop.f32.mrb[1].mxu0 }
 0x142   :  { %v793_v62 = vpop.f32.mrb[2].mxu0  ;;  %v2368_v12 = vadd.f32 %v791_v60, %v3144_v50  ;;  %v3153_v60 = vld [vmem:[%s3630_s6] ss:$0 sm:$0xff] }
 0x143   :  { %v2038_v2 = vmul.f32 -1.442695, %v2367_v56  ;;  %v2369_v8 = vadd.f32 %v793_v62, %v3142_v39  ;;  %v795_v10 = vpop.f32.mrb[3].mxu0 }
 0x144   :  { %v2370_v18 = vadd.f32 %v795_v10, %v3144_v50  ;;  %v2040_v15 = vmul.f32 -1.442695, %v2368_v12 }
 0x145   :  { %2509 = vpow2.f32 %v2038_v2  ;;  %v2039_v14 = vmul.f32 -1.442695, %v2369_v8  ;;  %v867_v8 = vadd.f32 %v3153_v60, %v832_v17 }
 0x146   :  { %v2041_v22 = vmul.f32 -1.442695, %v2370_v18 }
 0x147   :  { %2511 = vpow2.f32 %v2039_v14  ;;  %v466_v14 = vadd.f32 %v3099_v28, %v3093_v20 }
 0x148   :  { %2513 = vpow2.f32 %v2040_v15  ;;  %v868_v15 = vadd.f32 %v3153_v60, %v835_v21 }
 0x149   :  { %2515 = vpow2.f32 %v2041_v22 }
 0x14f   :  { %v2510_v19 = vpop.eup %2509 }
 0x150   :  { %v847_v30 = vadd.f32 1.0, %v2510_v19  ;;  %v469_v19 = vadd.f32 %v3104_v35, %v3093_v20  ;;  %v893_v35 = vpop.permute.xlu0 %892 }
 0x151   :  { %v2512_v37 = vpop.eup %2511  ;;  %vm895_vm2 = vcmp.eq.s32.totalorder %v893_v35, 1 }
 0x152   :  { %2517 = vrcp.f32 %v847_v30  ;;  %v848_v44 = vadd.f32 1.0, %v2512_v37  ;;  %v2514_v56 = vpop.eup %2513 }
 0x153   :  { %v2516_v62 = vpop.eup %2515  ;;  %v861_v2 = vadd.f32 1.0, %v2514_v56 }
 0x154   :  { %2519 = vrcp.f32 %v848_v44  ;;  %v862_v10 = vadd.f32 1.0, %v2516_v62 }
 0x155   :  { %2521 = vrcp.f32 %v861_v2 }
 0x156   :  { %2523 = vrcp.f32 %v862_v10 }
 0x15c   :  { %v2518_v12 = vpop.eup %2517 }
 0x15d   :  { %v869_v18 = vmul.f32 %v2518_v12, %v867_v8 }
 0x15e   :  { %v2520_v22 = vpop.eup %2519 }
 0x15f   :  { %v871_v30 = vadd.f32 %v869_v18, %v466_v14  ;;  %v870_v37 = vmul.f32 %v2520_v22, %v868_v15  ;;  %v2522_v17 = vpop.eup %2521 }
 0x160   :  { %v2524_v56 = vpop.eup %2523  ;;  %v875_v62 = vsub.f32 1.0, %v2522_v17  ;;  %v879_v28 = vmul.f32 %v2522_v17, %v3027_v6 }
 0x161   :  { %2525 = vtanh.f32 %v871_v30  ;;  %v872_v44 = vadd.f32 %v870_v37, %v469_v19  ;;  %v876_v2 = vsub.f32 1.0, %v2524_v56  ;;  %v880_v12 = vmul.f32 %v2524_v56, %v3032_v7 }
 0x163   :  { %2527 = vtanh.f32 %v872_v44 }
 0x16b   :  { %v2526_v47 = vpop.eup %2525 }
 0x16c   :  { %v877_v8 = vmul.f32 %v2526_v47, %v875_v62  ;;  %v3638_v47 = vmov 0.0  }
 0x16d   :  { %v2528_v21 = vpop.eup %2527 }
 0x16e   :  { %v878_v13 = vmul.f32 %v2528_v21, %v876_v2  ;;  %v881_v20 = vadd.f32 %v879_v28, %v877_v8 }
 0x170   :  { %v882_v10 = vadd.f32 %v880_v12, %v878_v13  ;;  %v3164_v14 = vsel %vm894_vm1, %v881_v20, %v3027_v6 }
 0x172   :  { %v3167_v18 = vsel %vm895_vm2, %v882_v10, %v3032_v7 }
 0x173   :  { %v905_v15 = vpack.c.bf16 %v3167_v18, %v3164_v14 }
 0x175   :  { %939 = vmatmul.mubr.bf16.vlgmr.msra.gmra.mrb[4].mxu0 %v905_v15  ;;  %2244 = vmatmul.mubr.bf16.vlgmr.msra.gmra.mrb[20].mxu1 %v905_v15 }
 0x176   :  { %1059 = vmatpush1.bf16.msra.mxu0 %v2827_v24  ;;  %2248 = vmatpush3.bf16.msra.mxu1 %v2915_v43 }
 0x177   :  { %1060 = vmatprep.subr.bf16.mxu0 %v2832_v25  ;;  %2249 = vmatprep.subr.bf16.mxu1 %v3638_v47 }
 0x178   :  { %1090 = vmatprep.mubr.bf16.mxu0 %v3639_v3  ;;  %2263 = vmatprep.mubr.msk.bf16.mxu1 %vm2697_vm8, %v3638_v47 }
 0x17a   :  { %1061 = vmatpush1.bf16.msra.mxu0 %v2841_v27  ;;  %2250 = vmatpush3.bf16.msra.mxu1 %v2938_v49 }
 0x17b   :  { %1062 = vmatprep.subr.bf16.mxu0 %v2852_v29  ;;  %2251 = vmatprep.subr.bf16.mxu1 %v3638_v47 }
 0x17e   :  { %1063 = vmatpush1.bf16.msra.mxu0 %v2859_v31  ;;  %2252 = vmatpush3.bf16.msra.mxu1 %v2959_v53 }
 0x17f   :  { %1064 = vmatprep.subr.bf16.mxu0 %v2864_v32  ;;  %2253 = vmatprep.subr.bf16.mxu1 %v3638_v47 }
 0x182   :  { %1065 = vmatpush1.bf16.msra.mxu0 %v2873_v34  ;;  %2254 = vmatpush3.bf16.msra.mxu1 %v2977_v57 }
 0x183   :  { %1066 = vmatprep.subr.bf16.mxu0 %v2884_v36  ;;  %2255 = vmatprep.subr.bf16.mxu1 %v3638_v47 }
 0x186   :  { %1067 = vmatpush1.bf16.msra.mxu0 %v2901_v40  ;;  %2256 = vmatpush3.bf16.msra.mxu1 %v2988_v59 }
 0x187   :  { %1068 = vmatprep.subr.bf16.mxu0 %v2909_v41  ;;  %2257 = vmatprep.subr.bf16.mxu1 %v3638_v47 }
 0x18a   :  { %1069 = vmatpush1.bf16.msra.mxu0 %v2923_v45  ;;  %2258 = vmatpush3.bf16.msra.mxu1 %v3000_v63 }
 0x18b   :  { %1070 = vmatprep.subr.bf16.mxu0 %v2930_v46  ;;  %2259 = vmatprep.subr.bf16.mxu1 %v3638_v47 }
 0x18e   :  { %1071 = vmatpush1.bf16.msra.mxu0 %v2945_v51  ;;  %2260 = vmatpush3.bf16.msra.mxu1 %v3009_v1 }
 0x18f   :  { %1072 = vmatprep.subr.bf16.mxu0 %v2953_v52  ;;  %2261 = vmatprep.subr.bf16.mxu1 %v3638_v47 }
 0x192   :  { %1073 = vmatpush1.bf16.msra.mxu0 %v2967_v55  ;;  %2262 = vmatpush3.bf16.msra.mxu1 %v3019_v5 }
 0x193   :  { %1210 = vmatprep.subr.bf16.mxu0 %v2822_v23  ;;  %2267 = vmatprep.subr.bf16.mxu1 %v3638_v47 }
 0x248   :  { %v940_v6 = vpop.f32.mrb[4].mxu0  ;;  %v983_v7 = vpop.f32.mrb[20].mxu1 }
 0x249   :  { %v2371_v13 = vadd.f32 %v940_v6, %v3142_v39  ;;  %v942_v22 = vpop.f32.mrb[5].mxu0  ;;  %v2245_v19 = vpop.f32.mrb[21].mxu1 }
 0x24a   :  { %v944_v30 = vpop.f32.mrb[6].mxu0  ;;  %v986_v37 = vpop.f32.mrb[22].mxu1  ;;  %v2372_v28 = vadd.f32 %v942_v22, %v3144_v50  ;;  %v1018_v22 = vadd.f32 %v3153_v60, %v983_v7 }
 0x24b   :  { %v2044_v44 = vmul.f32 -1.442695, %v2371_v13  ;;  %v2373_v17 = vadd.f32 %v944_v30, %v3142_v39  ;;  %v946_v56 = vpop.f32.mrb[7].mxu0  ;;  %v2246_v62 = vpop.f32.mrb[23].mxu1 }
 0x24c   :  { %v2374_v8 = vadd.f32 %v946_v56, %v3144_v50  ;;  %v2046_v21 = vmul.f32 -1.442695, %v2372_v28  ;;  %v1019_v56 = vadd.f32 %v3153_v60, %v986_v37 }
 0x24d   :  { %2529 = vpow2.f32 %v2044_v44  ;;  %v2045_v2 = vmul.f32 -1.442695, %v2373_v17 }
 0x24e   :  { %v2047_v12 = vmul.f32 -1.442695, %v2374_v8 }
 0x24f   :  { %2531 = vpow2.f32 %v2045_v2 }
 0x250   :  { %2533 = vpow2.f32 %v2046_v21 }
 0x251   :  { %2535 = vpow2.f32 %v2047_v12 }
 0x257   :  { %v2530_v20 = vpop.eup %2529 }
 0x258   :  { %v998_v35 = vadd.f32 1.0, %v2530_v20  ;;  %v1042_v20 = vpop.permute.xlu1 %1041 }
 0x259   :  { %v2532_v10 = vpop.eup %2531  ;;  %vm1046_vm3 = vcmp.eq.s32.totalorder %v1042_v20, 1 }
 0x25a   :  { %2537 = vrcp.f32 %v998_v35  ;;  %v999_v15 = vadd.f32 1.0, %v2532_v10  ;;  %v2534_v6 = vpop.eup %2533 }
 0x25b   :  { %v2536_v13 = vpop.eup %2535  ;;  %v1012_v19 = vadd.f32 1.0, %v2534_v6 }
 0x25c   :  { %2539 = vrcp.f32 %v999_v15  ;;  %v1013_v30 = vadd.f32 1.0, %v2536_v13 }
 0x25d   :  { %2541 = vrcp.f32 %v1012_v19 }
 0x25e   :  { %2543 = vrcp.f32 %v1013_v30 }
 0x264   :  { %v2538_v44 = vpop.eup %2537 }
 0x265   :  { %v1020_v17 = vmul.f32 %v2538_v44, %v1018_v22  ;;  %v1045_v22 = vpop.permute.xlu1 %1044 }
 0x266   :  { %v2540_v62 = vpop.eup %2539  ;;  %vm1047_vm4 = vcmp.eq.s32.totalorder %v1045_v22, 1 }
 0x267   :  { %v1022_v28 = vadd.f32 %v1020_v17, %v3097_v26  ;;  %v1021_v2 = vmul.f32 %v2540_v62, %v1019_v56  ;;  %v2542_v21 = vpop.eup %2541 }
 0x268   :  { %v2544_v12 = vpop.eup %2543  ;;  %v1026_v35 = vsub.f32 1.0, %v2542_v21  ;;  %v1030_v15 = vmul.f32 %v2542_v21, %v3164_v14 }
 0x269   :  { %2545 = vtanh.f32 %v1022_v28  ;;  %v1023_v8 = vadd.f32 %v1021_v2, %v3102_v33  ;;  %v1027_v6 = vsub.f32 1.0, %v2544_v12  ;;  %v1031_v26 = vmul.f32 %v2544_v12, %v3167_v18 }
 0x26b   :  { %2547 = vtanh.f32 %v1023_v8 }
 0x273   :  { %v2546_v7 = vpop.eup %2545 }
 0x274   :  { %v1028_v10 = vmul.f32 %v2546_v7, %v1026_v35 }
 0x275   :  { %v2548_v13 = vpop.eup %2547 }
 0x276   :  { %v1032_v37 = vadd.f32 %v1030_v15, %v1028_v10  ;;  %v1029_v19 = vmul.f32 %v2548_v13, %v1027_v6 }
 0x278   :  { %v1033_v30 = vadd.f32 %v1031_v26, %v1029_v19  ;;  %v3217_v33 = vsel %vm1046_vm3, %v1032_v37, %v3164_v14 }
 0x27a   :  { %v3220_v44 = vsel %vm1047_vm4, %v1033_v30, %v3167_v18 }
 0x27b   :  { %v1057_v17 = vpack.c.bf16 %v3220_v44, %v3217_v33 }
 0x27d   :  { %1091 = vmatmul.mubr.bf16.vlgmr.msra.gmra.mrb[8].mxu0 %v1057_v17  ;;  %2264 = vmatmul.mubr.bf16.vlgmr.msra.gmra.mrb[24].mxu1 %v1057_v17 }
 0x27e   :  { %1211 = vmatpush1.bf16.msra.mxu0 %v2827_v24  ;;  %2268 = vmatpush3.bf16.msra.mxu1 %v2915_v43 }
 0x27f   :  { %1212 = vmatprep.subr.bf16.mxu0 %v2832_v25  ;;  %2269 = vmatprep.subr.bf16.mxu1 %v3638_v47 }
 0x280   :  { %1242 = vmatprep.mubr.bf16.mxu0 %v3639_v3  ;;  %2283 = vmatprep.mubr.msk.bf16.mxu1 %vm2697_vm8, %v3638_v47 }
 0x282   :  { %1213 = vmatpush1.bf16.msra.mxu0 %v2841_v27  ;;  %2270 = vmatpush3.bf16.msra.mxu1 %v2938_v49 }
 0x283   :  { %1214 = vmatprep.subr.bf16.mxu0 %v2852_v29  ;;  %2271 = vmatprep.subr.bf16.mxu1 %v3638_v47 }
 0x286   :  { %1215 = vmatpush1.bf16.msra.mxu0 %v2859_v31  ;;  %2272 = vmatpush3.bf16.msra.mxu1 %v2959_v53 }
 0x287   :  { %1216 = vmatprep.subr.bf16.mxu0 %v2864_v32  ;;  %2273 = vmatprep.subr.bf16.mxu1 %v3638_v47 }
 0x28a   :  { %1217 = vmatpush1.bf16.msra.mxu0 %v2873_v34  ;;  %2274 = vmatpush3.bf16.msra.mxu1 %v2977_v57 }
 0x28b   :  { %1218 = vmatprep.subr.bf16.mxu0 %v2884_v36  ;;  %2275 = vmatprep.subr.bf16.mxu1 %v3638_v47 }
 0x28e   :  { %1219 = vmatpush1.bf16.msra.mxu0 %v2901_v40  ;;  %2276 = vmatpush3.bf16.msra.mxu1 %v2988_v59 }
 0x28f   :  { %1220 = vmatprep.subr.bf16.mxu0 %v2909_v41  ;;  %2277 = vmatprep.subr.bf16.mxu1 %v3638_v47 }
 0x292   :  { %1221 = vmatpush1.bf16.msra.mxu0 %v2923_v45  ;;  %2278 = vmatpush3.bf16.msra.mxu1 %v3000_v63 }
 0x293   :  { %1222 = vmatprep.subr.bf16.mxu0 %v2930_v46  ;;  %2279 = vmatprep.subr.bf16.mxu1 %v3638_v47 }
 0x296   :  { %1223 = vmatpush1.bf16.msra.mxu0 %v2945_v51  ;;  %2280 = vmatpush3.bf16.msra.mxu1 %v3009_v1 }
 0x297   :  { %1224 = vmatprep.subr.bf16.mxu0 %v2953_v52  ;;  %2281 = vmatprep.subr.bf16.mxu1 %v3638_v47 }
 0x29a   :  { %1225 = vmatpush1.bf16.msra.mxu0 %v2967_v55  ;;  %2282 = vmatpush3.bf16.msra.mxu1 %v3019_v5 }
 0x29b   :  { %1362 = vmatprep.subr.bf16.mxu0 %v2822_v23  ;;  %2287 = vmatprep.subr.bf16.mxu1 %v3638_v47 }
 0x350   :  { %v1092_v24 = vpop.f32.mrb[8].mxu0  ;;  %v1135_v25 = vpop.f32.mrb[24].mxu1 }
 0x351   :  { %v2375_v27 = vadd.f32 %v1092_v24, %v3142_v39  ;;  %v1094_v14 = vpop.f32.mrb[9].mxu0  ;;  %v2265_v18 = vpop.f32.mrb[25].mxu1  ;;  %v1170_v22 = vadd.f32 %v3153_v60, %v1135_v25 }
 0x352   :  { %v1096_v56 = vpop.f32.mrb[10].mxu0  ;;  %v1138_v62 = vpop.f32.mrb[26].mxu1  ;;  %v2376_v12 = vadd.f32 %v1094_v14, %v3144_v50 }
 0x353   :  { %v2050_v28 = vmul.f32 -1.442695, %v2375_v27  ;;  %v2377_v2 = vadd.f32 %v1096_v56, %v3142_v39  ;;  %v1098_v8 = vpop.f32.mrb[11].mxu0  ;;  %v2266_v21 = vpop.f32.mrb[27].mxu1  ;;  %v1171_v27 = vadd.f32 %v3153_v60, %v1138_v62 }
 0x354   :  { %v2378_v23 = vadd.f32 %v1098_v8, %v3144_v50  ;;  %v2052_v35 = vmul.f32 -1.442695, %v2376_v12 }
 0x355   :  { %2549 = vpow2.f32 %v2050_v28  ;;  %v2051_v20 = vmul.f32 -1.442695, %v2377_v2 }
 0x356   :  { %v2053_v7 = vmul.f32 -1.442695, %v2378_v23 }
 0x357   :  { %2551 = vpow2.f32 %v2051_v20 }
 0x358   :  { %2553 = vpow2.f32 %v2052_v35 }
 0x359   :  { %2555 = vpow2.f32 %v2053_v7 }
 0x35f   :  { %v2550_v10 = vpop.eup %2549 }
 0x360   :  { %v1150_v15 = vadd.f32 1.0, %v2550_v10 }
 0x361   :  { %v2552_v6 = vpop.eup %2551 }
 0x362   :  { %2557 = vrcp.f32 %v1150_v15  ;;  %v1151_v13 = vadd.f32 1.0, %v2552_v6  ;;  %v2554_v37 = vpop.eup %2553  ;;  %v1197_v15 = vpop.permute.xlu1 %1196 }
 0x363   :  { %v2556_v19 = vpop.eup %2555  ;;  %v1164_v26 = vadd.f32 1.0, %v2554_v37  ;;  %vm1199_vm6 = vcmp.eq.s32.totalorder %v1197_v15, 1 }
 0x364   :  { %2559 = vrcp.f32 %v1151_v13  ;;  %v1165_v30 = vadd.f32 1.0, %v2556_v19  ;;  %v3280_v19 = vld [vmem:[%s3628_s4] ss:$12 sps:$4 sm:$0xff]  }
 0x365   :  { %2561 = vrcp.f32 %v1164_v26 }
 0x366   :  { %2563 = vrcp.f32 %v1165_v30 }
 0x36c   :  { %v2558_v17 = vpop.eup %2557 }
 0x36d   :  { %v1172_v24 = vmul.f32 %v2558_v17, %v1170_v22 }
 0x36e   :  { %v2560_v14 = vpop.eup %2559 }
 0x36f   :  { %v1174_v18 = vadd.f32 %v1172_v24, %v3110_v42  ;;  %v1173_v56 = vmul.f32 %v2560_v14, %v1171_v27  ;;  %v2562_v2 = vpop.eup %2561  ;;  %v1194_v42 = vpop.permute.xlu0 %1193 }
 0x370   :  { %v2564_v8 = vpop.eup %2563  ;;  %v1178_v21 = vsub.f32 1.0, %v2562_v2  ;;  %v1182_v25 = vmul.f32 %v2562_v2, %v3217_v33  ;;  %vm1198_vm5 = vcmp.eq.s32.totalorder %v1194_v42, 1 }
 0x371   :  { %2565 = vtanh.f32 %v1174_v18  ;;  %v1175_v28 = vadd.f32 %v1173_v56, %v3116_v54  ;;  %v1179_v20 = vsub.f32 1.0, %v2564_v8  ;;  %v1183_v62 = vmul.f32 %v2564_v8, %v3220_v44 }
 0x373   :  { %2567 = vtanh.f32 %v1175_v28 }
 0x37b   :  { %v2566_v12 = vpop.eup %2565 }
 0x37c   :  { %v1180_v23 = vmul.f32 %v2566_v12, %v1178_v21 }
 0x37d   :  { %v2568_v35 = vpop.eup %2567 }
 0x37e   :  { %v1181_v7 = vmul.f32 %v2568_v35, %v1179_v20  ;;  %v1184_v10 = vadd.f32 %v1182_v25, %v1180_v23 }
 0x380   :  { %v1185_v6 = vadd.f32 %v1183_v62, %v1181_v7  ;;  %v3270_v54 = vsel %vm1198_vm5, %v1184_v10, %v3217_v33  ;;  %v3287_v33 = vld [vmem:[%s3628_s4 + $0x1c] ss:$12 sps:$4 sm:$0xff]  }
 0x382   :  { %v3273_v13 = vsel %vm1199_vm6, %v1185_v6, %v3220_v44  ;;  %v3297_v44 = vld [vmem:[%s3628_s4 + $0x18] ss:$12 sps:$4 sm:$0xff]  }
 0x383   :  { %v1209_v37 = vpack.c.bf16 %v3273_v13, %v3270_v54 }
 0x385   :  { %1243 = vmatmul.mubr.bf16.vlgmr.msra.gmra.mrb[12].mxu0 %v1209_v37  ;;  %2284 = vmatmul.mubr.bf16.vlgmr.msra.gmra.mrb[28].mxu1 %v1209_v37 }
 0x386   :  { %1363 = vmatpush1.bf16.msra.mxu0 %v3280_v19  ;;  %2288 = vmatpush3.bf16.msra.mxu1 %v2915_v43 }
 0x387   :  { %1364 = vmatprep.subr.bf16.mxu0 %v3287_v33  ;;  %2289 = vmatprep.subr.bf16.mxu1 %v3638_v47 }
 0x388   :  { %1394 = vmatprep.mubr.bf16.mxu0 %v3639_v3  ;;  %2303 = vmatprep.mubr.msk.bf16.mxu1 %vm2697_vm8, %v3638_v47 }
 0x38a   :  { %1365 = vmatpush1.bf16.msra.mxu0 %v3297_v44  ;;  %2290 = vmatpush3.bf16.msra.mxu1 %v2938_v49 }
 0x38b   :  { %1366 = vmatprep.subr.bf16.mxu0 %v2852_v29  ;;  %2291 = vmatprep.subr.bf16.mxu1 %v3638_v47  ;;  %v3328_v29 = vld [vmem:[%s3628_s4 + $0x4] ss:$12 sps:$4 sm:$0xff]  }
 0x38e   :  { %1367 = vmatpush1.bf16.msra.mxu0 %v2859_v31  ;;  %2292 = vmatpush3.bf16.msra.mxu1 %v2959_v53 }
 0x38f   :  { %1368 = vmatprep.subr.bf16.mxu0 %v2864_v32  ;;  %2293 = vmatprep.subr.bf16.mxu1 %v3638_v47 }
 0x392   :  { %1369 = vmatpush1.bf16.msra.mxu0 %v2873_v34  ;;  %2294 = vmatpush3.bf16.msra.mxu1 %v2977_v57 }
 0x393   :  { %1370 = vmatprep.subr.bf16.mxu0 %v2884_v36  ;;  %2295 = vmatprep.subr.bf16.mxu1 %v3638_v47 }
 0x396   :  { %1371 = vmatpush1.bf16.msra.mxu0 %v2901_v40  ;;  %2296 = vmatpush3.bf16.msra.mxu1 %v2988_v59 }
 0x397   :  { %1372 = vmatprep.subr.bf16.mxu0 %v2909_v41  ;;  %2297 = vmatprep.subr.bf16.mxu1 %v3638_v47 }
 0x39a   :  { %1373 = vmatpush1.bf16.msra.mxu0 %v2923_v45  ;;  %2298 = vmatpush3.bf16.msra.mxu1 %v3000_v63 }
 0x39b   :  { %1374 = vmatprep.subr.bf16.mxu0 %v2930_v46  ;;  %2299 = vmatprep.subr.bf16.mxu1 %v3638_v47 }
 0x39e   :  { %1375 = vmatpush1.bf16.msra.mxu0 %v2945_v51  ;;  %2300 = vmatpush3.bf16.msra.mxu1 %v3009_v1 }
 0x39f   :  { %1376 = vmatprep.subr.bf16.mxu0 %v2953_v52  ;;  %2301 = vmatprep.subr.bf16.mxu1 %v3638_v47 }
 0x3a2   :  { %1377 = vmatpush1.bf16.msra.mxu0 %v2967_v55  ;;  %2302 = vmatpush3.bf16.msra.mxu1 %v3019_v5 }
 0x3a3   :  { %1514 = vmatprep.subr.bf16.mxu0 %v3328_v29  ;;  %2307 = vmatprep.subr.bf16.mxu1 %v3638_v47 }
 0x458   :  { %v1244_v31 = vpop.f32.mrb[12].mxu0  ;;  %v1287_v32 = vpop.f32.mrb[28].mxu1 }
 0x459   :  { %v2379_v34 = vadd.f32 %v1244_v31, %v3142_v39  ;;  %v1246_v36 = vpop.f32.mrb[13].mxu0  ;;  %v2285_v40 = vpop.f32.mrb[29].mxu1  ;;  %v1322_v18 = vadd.f32 %v3153_v60, %v1287_v32 }
 0x45a   :  { %v1248_v41 = vpop.f32.mrb[14].mxu0  ;;  %v1290_v43 = vpop.f32.mrb[30].mxu1  ;;  %v2380_v52 = vadd.f32 %v1246_v36, %v3144_v50 }
 0x45b   :  { %v2056_v45 = vmul.f32 -1.442695, %v2379_v34  ;;  %v2381_v46 = vadd.f32 %v1248_v41, %v3142_v39  ;;  %v1250_v49 = vpop.f32.mrb[15].mxu0  ;;  %v2286_v51 = vpop.f32.mrb[31].mxu1  ;;  %v1323_v8 = vadd.f32 %v3153_v60, %v1290_v43  ;;  %v3354_v43 = vld [vmem:[%s3628_s4 + $0x8] ss:$12 sps:$4 sm:$0xff]  }
 0x45c   :  { %v2382_v55 = vadd.f32 %v1250_v49, %v3144_v50  ;;  %v2058_v57 = vmul.f32 -1.442695, %v2380_v52  ;;  %v1349_v34 = vpop.permute.xlu1 %1348  ;;  %v3391_v49 = vld [vmem:[%s3628_s4 + $0x4c] ss:$12 sps:$4 sm:$0xff]   ;;  %v3398_v51 = vld [vmem:[%s3628_s4 + $0x48] ss:$12 sps:$4 sm:$0xff]  }
 0x45d   :  { %2569 = vpow2.f32 %v2056_v45  ;;  %v2057_v53 = vmul.f32 -1.442695, %v2381_v46  ;;  %vm1351_vm9 = vcmp.eq.s32.totalorder %v1349_v34, 1  ;;  %v3379_v45 = vld [vmem:[%s3628_s4 + $0x30] ss:$12 sps:$4 sm:$0xff]  }
 0x45e   :  { %v2059_v59 = vmul.f32 -1.442695, %v2382_v55  ;;  %v3385_v46 = vld [vmem:[%s3628_s4 + $0x38] ss:$12 sps:$4 sm:$0xff]   ;;  %v3404_v52 = vld [vmem:[%s3628_s4 + $0x50] ss:$12 sps:$4 sm:$0xff]  }
 0x45f   :  { %2571 = vpow2.f32 %v2057_v53  ;;  %v3410_v53 = vld [vmem:[%s3628_s4 + $0x64] ss:$12 sps:$4 sm:$0xff]   ;;  %v3417_v55 = vld [vmem:[%s3628_s4 + $0x60] ss:$12 sps:$4 sm:$0xff]  }
 0x460   :  { %2573 = vpow2.f32 %v2058_v57  ;;  %v3423_v57 = vld [vmem:[%s3628_s4 + $0x68] ss:$12 sps:$4 sm:$0xff]  }
 0x461   :  { %2575 = vpow2.f32 %v2059_v59  ;;  %v3429_v59 = vld [vmem:[%s3628_s4 + $0x7c] ss:$12 sps:$4 sm:$0xff]  }
 0x467   :  { %v2570_v26 = vpop.eup %2569 }
 0x468   :  { %v1302_v22 = vadd.f32 1.0, %v2570_v26  ;;  %v3436_v26 = vld [vmem:[%s3628_s4 + $0x78] ss:$12 sps:$4 sm:$0xff]  }
 0x469   :  { %v2572_v30 = vpop.eup %2571 }
 0x46a   :  { %2577 = vrcp.f32 %v1302_v22  ;;  %v1303_v17 = vadd.f32 1.0, %v2572_v30  ;;  %v2574_v24 = vpop.eup %2573  ;;  %v3443_v22 = vld [vmem:[%s3628_s4 + $0x94] ss:$12 sps:$4 sm:$0xff]   ;;  %v3450_v30 = vld [vmem:[%s3628_s4 + $0x90] ss:$12 sps:$4 sm:$0xff]  }
 0x46b   :  { %v2576_v27 = vpop.eup %2575  ;;  %v1316_v14 = vadd.f32 1.0, %v2574_v24 }
 0x46c   :  { %2579 = vrcp.f32 %v1303_v17  ;;  %v1317_v56 = vadd.f32 1.0, %v2576_v27  ;;  %v3464_v17 = vld [vmem:[%s3628_s4 + $0xa8] ss:$12 sps:$4 sm:$0xff]  }
 0x46d   :  { %2581 = vrcp.f32 %v1316_v14 }
 0x46e   :  { %2583 = vrcp.f32 %v1317_v56 }
 0x474   :  { %v2578_v28 = vpop.eup %2577 }
 0x475   :  { %v1324_v2 = vmul.f32 %v2578_v28, %v1322_v18 }
 0x476   :  { %v2580_v21 = vpop.eup %2579 }
 0x477   :  { %v1326_v12 = vadd.f32 %v1324_v2, %v3107_v38  ;;  %v1325_v25 = vmul.f32 %v2580_v21, %v1323_v8  ;;  %v2582_v23 = vpop.eup %2581  ;;  %v1346_v38 = vpop.permute.xlu0 %1345 }
 0x478   :  { %v2584_v35 = vpop.eup %2583  ;;  %v1330_v62 = vsub.f32 1.0, %v2582_v23  ;;  %v1334_v10 = vmul.f32 %v2582_v23, %v3270_v54  ;;  %vm1350_vm7 = vcmp.eq.s32.totalorder %v1346_v38, 1 }
 0x479   :  { %2585 = vtanh.f32 %v1326_v12  ;;  %v1327_v20 = vadd.f32 %v1325_v25, %v3113_v48  ;;  %v1331_v42 = vsub.f32 1.0, %v2584_v35  ;;  %v1335_v37 = vmul.f32 %v2584_v35, %v3273_v13 }
 0x47b   :  { %2587 = vtanh.f32 %v1327_v20 }
 0x483   :  { %v2586_v7 = vpop.eup %2585 }
 0x484   :  { %v1332_v15 = vmul.f32 %v2586_v7, %v1330_v62 }
 0x485   :  { %v2588_v6 = vpop.eup %2587 }
 0x486   :  { %v1333_v31 = vmul.f32 %v2588_v6, %v1331_v42  ;;  %v1336_v32 = vadd.f32 %v1334_v10, %v1332_v15 }
 0x488   :  { %v1337_v36 = vadd.f32 %v1335_v37, %v1333_v31  ;;  %v3343_v48 = vsel %vm1350_vm7, %v1336_v32, %v3270_v54  ;;  %v3366_v54 = vld [vmem:[%s3628_s4 + $0x20] ss:$12 sps:$4 sm:$0xff]  }
 0x48a   :  { %v3346_v40 = vsel %vm1351_vm9, %v1337_v36, %v3273_v13  ;;  %v3372_v13 = vld [vmem:[%s3628_s4 + $0x34] ss:$12 sps:$4 sm:$0xff]  }
 0x48b   :  { %v1361_v41 = vpack.c.bf16 %v3346_v40, %v3343_v48 }
 0x48d   :  { %1395 = vmatmul.mubr.bf16.vlgmr.msra.gmra.mrb[16].mxu0 %v1361_v41  ;;  %2304 = vmatmul.mubr.bf16.vlgmr.msra.gmra.mrb[32].mxu1 %v1361_v41 }
 0x48e   :  { %1515 = vmatpush1.bf16.msra.mxu0 %v3280_v19  ;;  %2308 = vmatpush3.bf16.msra.mxu1 %v3354_v43 }
 0x48f   :  { %1516 = vmatprep.subr.bf16.mxu0 %v3287_v33  ;;  %2309 = vmatprep.subr.bf16.mxu1 %v3638_v47 }
 0x490   :  { %1546 = vmatprep.mubr.bf16.mxu0 %v3639_v3  ;;  %2323 = vmatprep.mubr.msk.bf16.mxu1 %vm2697_vm8, %v3638_v47 }
 0x492   :  { %1517 = vmatpush1.bf16.msra.mxu0 %v3297_v44  ;;  %2310 = vmatpush3.bf16.msra.mxu1 %v3366_v54 }
 0x493   :  { %1518 = vmatprep.subr.bf16.mxu0 %v3372_v13  ;;  %2311 = vmatprep.subr.bf16.mxu1 %v3638_v47 }
 0x496   :  { %1519 = vmatpush1.bf16.msra.mxu0 %v3379_v45  ;;  %2312 = vmatpush3.bf16.msra.mxu1 %v3385_v46 }
 0x497   :  { %1520 = vmatprep.subr.bf16.mxu0 %v3391_v49  ;;  %2313 = vmatprep.subr.bf16.mxu1 %v3638_v47 }
 0x49a   :  { %1521 = vmatpush1.bf16.msra.mxu0 %v3398_v51  ;;  %2314 = vmatpush3.bf16.msra.mxu1 %v3404_v52 }
 0x49b   :  { %1522 = vmatprep.subr.bf16.mxu0 %v3410_v53  ;;  %2315 = vmatprep.subr.bf16.mxu1 %v3638_v47 }
 0x49e   :  { %1523 = vmatpush1.bf16.msra.mxu0 %v3417_v55  ;;  %2316 = vmatpush3.bf16.msra.mxu1 %v3423_v57 }
 0x49f   :  { %1524 = vmatprep.subr.bf16.mxu0 %v3429_v59  ;;  %2317 = vmatprep.subr.bf16.mxu1 %v3638_v47 }
 0x4a2   :  { %1525 = vmatpush1.bf16.msra.mxu0 %v3436_v26  ;;  %2318 = vmatpush3.bf16.msra.mxu1 %v3000_v63  ;;  %v3457_v63 = vld [vmem:[%s3628_s4 + $0xac] ss:$12 sps:$4 sm:$0xff]  }
 0x4a3   :  { %1526 = vmatprep.subr.bf16.mxu0 %v3443_v22  ;;  %2319 = vmatprep.subr.bf16.mxu1 %v3638_v47 }
 0x4a6   :  { %1527 = vmatpush1.bf16.msra.mxu0 %v3450_v30  ;;  %2320 = vmatpush3.bf16.msra.mxu1 %v3009_v1 }
 0x4a7   :  { %1528 = vmatprep.subr.bf16.mxu0 %v3457_v63  ;;  %2321 = vmatprep.subr.bf16.mxu1 %v3638_v47 }
 0x4aa   :  { %1529 = vmatpush1.bf16.msra.mxu0 %v3464_v17  ;;  %2322 = vmatpush3.bf16.msra.mxu1 %v3019_v5 }
 0x4ab   :  { %1666 = vmatprep.subr.bf16.mxu0 %v3328_v29  ;;  %2327 = vmatprep.subr.bf16.mxu1 %v3638_v47 }
 0x560   :  { %v1396_v1 = vpop.f32.mrb[16].mxu0  ;;  %v1439_v24 = vpop.f32.mrb[32].mxu1 }
 0x561   :  { %v2383_v27 = vadd.f32 %v1396_v1, %v3142_v39  ;;  %v1398_v14 = vpop.f32.mrb[17].mxu0  ;;  %v2305_v18 = vpop.f32.mrb[33].mxu1  ;;  %v1474_v31 = vadd.f32 %v3153_v60, %v1439_v24 }
 0x562   :  { %v1400_v56 = vpop.f32.mrb[18].mxu0  ;;  %v1442_v28 = vpop.f32.mrb[34].mxu1  ;;  %v2384_v25 = vadd.f32 %v1398_v14, %v3144_v50 }
 0x563   :  { %v2062_v2 = vmul.f32 -1.442695, %v2383_v27  ;;  %v2385_v8 = vadd.f32 %v1400_v56, %v3142_v39  ;;  %v1402_v21 = vpop.f32.mrb[19].mxu0  ;;  %v2306_v12 = vpop.f32.mrb[35].mxu1  ;;  %v1475_v36 = vadd.f32 %v3153_v60, %v1442_v28 }
 0x564   :  { %v2386_v20 = vadd.f32 %v1402_v21, %v3144_v50  ;;  %v2064_v23 = vmul.f32 -1.442695, %v2384_v25 }
 0x565   :  { %2589 = vpow2.f32 %v2062_v2  ;;  %v2063_v5 = vmul.f32 -1.442695, %v2385_v8 }
 0x566   :  { %v2065_v35 = vmul.f32 -1.442695, %v2386_v20 }
 0x567   :  { %2591 = vpow2.f32 %v2063_v5 }
 0x568   :  { %2593 = vpow2.f32 %v2064_v23  ;;  %v1501_v23 = vpop.permute.xlu1 %1500 }
 0x569   :  { %2595 = vpow2.f32 %v2065_v35  ;;  %vm1503_vm11 = vcmp.eq.s32.totalorder %v1501_v23, 1 }
 0x56f   :  { %v2590_v62 = vpop.eup %2589 }
 0x570   :  { %v1454_v7 = vadd.f32 1.0, %v2590_v62 }
 0x571   :  { %v2592_v10 = vpop.eup %2591 }
 0x572   :  { %2597 = vrcp.f32 %v1454_v7  ;;  %v1455_v42 = vadd.f32 1.0, %v2592_v10  ;;  %v2594_v15 = vpop.eup %2593  ;;  %v3533_v10 = vld [vmem:[%s3628_s4 + $0xb0] ss:$12 sps:$4 sm:$0xff]  }
 0x573   :  { %v2596_v6 = vpop.eup %2595  ;;  %v1468_v37 = vadd.f32 1.0, %v2594_v15 }
 0x574   :  { %2599 = vrcp.f32 %v1455_v42  ;;  %v1469_v32 = vadd.f32 1.0, %v2596_v6 }
 0x575   :  { %2601 = vrcp.f32 %v1468_v37 }
 0x576   :  { %2603 = vrcp.f32 %v1469_v32 }
 0x57c   :  { %v2598_v38 = vpop.eup %2597 }
 0x57d   :  { %v1476_v34 = vmul.f32 %v2598_v38, %v1474_v31 }
 0x57e   :  { %v2600_v41 = vpop.eup %2599 }
 0x57f   :  { %v1478_v1 = vadd.f32 %v1476_v34, %v3122_v61  ;;  %v1477_v27 = vmul.f32 %v2600_v41, %v1475_v36  ;;  %v2602_v18 = vpop.eup %2601  ;;  %v1498_v61 = vpop.permute.xlu0 %1497 }
 0x580   :  { %v2604_v56 = vpop.eup %2603  ;;  %v1482_v2 = vsub.f32 1.0, %v2602_v18  ;;  %v1486_v24 = vmul.f32 %v2602_v18, %v3343_v48  ;;  %vm1502_vm10 = vcmp.eq.s32.totalorder %v1498_v61, 1 }
 0x581   :  { %2605 = vtanh.f32 %v1478_v1  ;;  %v1479_v14 = vadd.f32 %v1477_v27, %v3128_v4  ;;  %v1483_v21 = vsub.f32 1.0, %v2604_v56  ;;  %v1487_v28 = vmul.f32 %v2604_v56, %v3346_v40 }
 0x583   :  { %2607 = vtanh.f32 %v1479_v14 }
 0x58b   :  { %v2606_v8 = vpop.eup %2605 }
 0x58c   :  { %v1484_v12 = vmul.f32 %v2606_v8, %v1482_v2 }
 0x58d   :  { %v2608_v25 = vpop.eup %2607 }
 0x58e   :  { %v1485_v5 = vmul.f32 %v2608_v25, %v1483_v21  ;;  %v1488_v20 = vadd.f32 %v1486_v24, %v1484_v12 }
 0x590   :  { %v1489_v35 = vadd.f32 %v1487_v28, %v1485_v5  ;;  %v3481_v4 = vsel %vm1502_vm10, %v1488_v20, %v3343_v48  ;;  %v3515_v48 = vld [vmem:[%s3628_s4 + $0x80] ss:$12 sps:$4 sm:$0xff]  }
 0x592   :  { %v3484_v62 = vsel %vm1503_vm11, %v1489_v35, %v3346_v40  ;;  %v3524_v40 = vld [vmem:[%s3628_s4 + $0x98] ss:$12 sps:$4 sm:$0xff]  }
 0x593   :  { %v1513_v7 = vpack.c.bf16 %v3484_v62, %v3481_v4 }
 0x595   :  { %1547 = vmatmul.mubr.bf16.vlgmr.msra.gmra.mrb[20].mxu0 %v1513_v7  ;;  %2324 = vmatmul.mubr.bf16.vlgmr.msra.gmra.mrb[36].mxu1 %v1513_v7 }
 0x596   :  { %1667 = vmatpush1.bf16.msra.mxu0 %v3280_v19  ;;  %2328 = vmatpush3.bf16.msra.mxu1 %v3354_v43 }
 0x597   :  { %1668 = vmatprep.subr.bf16.mxu0 %v3287_v33  ;;  %2329 = vmatprep.subr.bf16.mxu1 %v3638_v47 }
 0x598   :  { %1698 = vmatprep.mubr.bf16.mxu0 %v3639_v3  ;;  %2343 = vmatprep.mubr.msk.bf16.mxu1 %vm2697_vm8, %v3638_v47 }
 0x59a   :  { %1669 = vmatpush1.bf16.msra.mxu0 %v3297_v44  ;;  %2330 = vmatpush3.bf16.msra.mxu1 %v3366_v54 }
 0x59b   :  { %1670 = vmatprep.subr.bf16.mxu0 %v3372_v13  ;;  %2331 = vmatprep.subr.bf16.mxu1 %v3638_v47 }
 0x59e   :  { %1671 = vmatpush1.bf16.msra.mxu0 %v3379_v45  ;;  %2332 = vmatpush3.bf16.msra.mxu1 %v3385_v46 }
 0x59f   :  { %1672 = vmatprep.subr.bf16.mxu0 %v3391_v49  ;;  %2333 = vmatprep.subr.bf16.mxu1 %v3638_v47 }
 0x5a2   :  { %1673 = vmatpush1.bf16.msra.mxu0 %v3398_v51  ;;  %2334 = vmatpush3.bf16.msra.mxu1 %v3404_v52 }
 0x5a3   :  { %1674 = vmatprep.subr.bf16.mxu0 %v3410_v53  ;;  %2335 = vmatprep.subr.bf16.mxu1 %v3638_v47 }
 0x5a6   :  { %1675 = vmatpush1.bf16.msra.mxu0 %v3417_v55  ;;  %2336 = vmatpush3.bf16.msra.mxu1 %v3423_v57 }
 0x5a7   :  { %1676 = vmatprep.subr.bf16.mxu0 %v3429_v59  ;;  %2337 = vmatprep.subr.bf16.mxu1 %v3638_v47 }
 0x5aa   :  { %1677 = vmatpush1.bf16.msra.mxu0 %v3436_v26  ;;  %2338 = vmatpush3.bf16.msra.mxu1 %v3515_v48 }
 0x5ab   :  { %1678 = vmatprep.subr.bf16.mxu0 %v3443_v22  ;;  %2339 = vmatprep.subr.bf16.mxu1 %v3638_v47 }
 0x5ae   :  { %1679 = vmatpush1.bf16.msra.mxu0 %v3450_v30  ;;  %2340 = vmatpush3.bf16.msra.mxu1 %v3524_v40 }
 0x5af   :  { %1680 = vmatprep.subr.bf16.mxu0 %v3457_v63  ;;  %2341 = vmatprep.subr.bf16.mxu1 %v3638_v47 }
 0x5b2   :  { %1681 = vmatpush1.bf16.msra.mxu0 %v3464_v17  ;;  %2342 = vmatpush3.bf16.msra.mxu1 %v3533_v10 }
 0x5b3   :  { %1818 = vmatprep.subr.bf16.mxu0 %v3328_v29  ;;  %2347 = vmatprep.subr.bf16.mxu1 %v3638_v47 }
 0x668   :  { %v1548_v42 = vpop.f32.mrb[20].mxu0  ;;  %v1591_v15 = vpop.f32.mrb[36].mxu1 }
 0x669   :  { %v2387_v6 = vadd.f32 %v1548_v42, %v3142_v39  ;;  %v1550_v37 = vpop.f32.mrb[21].mxu0  ;;  %v2325_v31 = vpop.f32.mrb[37].mxu1  ;;  %v1626_v5 = vadd.f32 %v3153_v60, %v1591_v15 }
 0x66a   :  { %v1552_v32 = vpop.f32.mrb[22].mxu0  ;;  %v1594_v38 = vpop.f32.mrb[38].mxu1  ;;  %v2388_v27 = vadd.f32 %v1550_v37, %v3144_v50 }
 0x66b   :  { %v2068_v34 = vmul.f32 -1.442695, %v2387_v6  ;;  %v2389_v36 = vadd.f32 %v1552_v32, %v3142_v39  ;;  %v1554_v41 = vpop.f32.mrb[23].mxu0  ;;  %v2326_v1 = vpop.f32.mrb[39].mxu1  ;;  %v1627_v35 = vadd.f32 %v3153_v60, %v1594_v38 }
 0x66c   :  { %v2390_v29 = vadd.f32 %v1554_v41, %v3144_v50  ;;  %v2070_v18 = vmul.f32 -1.442695, %v2388_v27 }
 0x66d   :  { %2609 = vpow2.f32 %v2068_v34  ;;  %v2069_v14 = vmul.f32 -1.442695, %v2389_v36 }
 0x66e   :  { %v2071_v56 = vmul.f32 -1.442695, %v2390_v29  ;;  %v1653_v29 = vpop.permute.xlu1 %1652 }
 0x66f   :  { %2611 = vpow2.f32 %v2069_v14  ;;  %vm1655_vm13 = vcmp.eq.s32.totalorder %v1653_v29, 1 }
 0x670   :  { %2613 = vpow2.f32 %v2070_v18 }
 0x671   :  { %2615 = vpow2.f32 %v2071_v56 }
 0x677   :  { %v2610_v2 = vpop.eup %2609 }
 0x678   :  { %v1606_v8 = vadd.f32 1.0, %v2610_v2 }
 0x679   :  { %v2612_v24 = vpop.eup %2611 }
 0x67a   :  { %2617 = vrcp.f32 %v1606_v8  ;;  %v1607_v21 = vadd.f32 1.0, %v2612_v24  ;;  %v2614_v12 = vpop.eup %2613 }
 0x67b   :  { %v2616_v25 = vpop.eup %2615  ;;  %v1620_v28 = vadd.f32 1.0, %v2614_v12 }
 0x67c   :  { %2619 = vrcp.f32 %v1607_v21  ;;  %v1621_v20 = vadd.f32 1.0, %v2616_v25 }
 0x67d   :  { %2621 = vrcp.f32 %v1620_v28 }
 0x67e   :  { %2623 = vrcp.f32 %v1621_v20 }
 0x684   :  { %v2618_v61 = vpop.eup %2617 }
 0x685   :  { %v1628_v23 = vmul.f32 %v2618_v61, %v1626_v5 }
 0x686   :  { %v2620_v7 = vpop.eup %2619 }
 0x687   :  { %v1630_v42 = vadd.f32 %v1628_v23, %v3119_v58  ;;  %v1629_v6 = vmul.f32 %v2620_v7, %v1627_v35  ;;  %v2622_v31 = vpop.eup %2621  ;;  %v1650_v58 = vpop.permute.xlu0 %1649 }
 0x688   :  { %v2624_v32 = vpop.eup %2623  ;;  %v1634_v34 = vsub.f32 1.0, %v2622_v31  ;;  %v1638_v15 = vmul.f32 %v2622_v31, %v3481_v4  ;;  %vm1654_vm12 = vcmp.eq.s32.totalorder %v1650_v58, 1 }
 0x689   :  { %2625 = vtanh.f32 %v1630_v42  ;;  %v1631_v37 = vadd.f32 %v1629_v6, %v3125_v0  ;;  %v1635_v41 = vsub.f32 1.0, %v2624_v32  ;;  %v1639_v60 = vmul.f32 %v2624_v32, %v3484_v62 }
 0x68b   :  { %2627 = vtanh.f32 %v1631_v37 }
 0x693   :  { %v2626_v36 = vpop.eup %2625 }
 0x694   :  { %v1636_v1 = vmul.f32 %v2626_v36, %v1634_v34  ;;  %v1805_v34 = vpop.permute.xlu1 %1804 }
 0x695   :  { %v2628_v27 = vpop.eup %2627  ;;  %vm1807_vm14 = vcmp.eq.s32.totalorder %v1805_v34, 1 }
 0x696   :  { %v1637_v38 = vmul.f32 %v2628_v27, %v1635_v41  ;;  %v1640_v14 = vadd.f32 %v1638_v15, %v1636_v1 }
 0x698   :  { %v1641_v18 = vadd.f32 %v1639_v60, %v1637_v38  ;;  %v3549_v0 = vsel %vm1654_vm12, %v1640_v14, %v3481_v4 }
 0x69a   :  { %v3552_v56 = vsel %vm1655_vm13, %v1641_v18, %v3484_v62  ;;  %v3596_v62 = vld [vmem:[%s3630_s6] ss:$0 sm:$0xff] }
 0x69b   :  { %v1665_v2 = vpack.c.bf16 %v3552_v56, %v3549_v0 }
 0x69d   :  { %1699 = vmatmul.mubr.bf16.vlgmr.msra.gmra.mrb[24].mxu0 %v1665_v2  ;;  %2344 = vmatmul.mubr.bf16.vlgmr.msra.gmra.mrb[40].mxu1 %v1665_v2 }
 0x69e   :  { %1819 = vmatpush1.bf16.msra.mxu0 %v3280_v19  ;;  %2348 = vmatpush3.bf16.msra.mxu1 %v3354_v43 }
 0x69f   :  { %1820 = vmatprep.subr.bf16.mxu0 %v3287_v33  ;;  %2349 = vmatprep.subr.bf16.mxu1 %v3638_v47 }
 0x6a0   :  { %1850 = vmatprep.mubr.bf16.mxu0 %v3639_v3  ;;  %2363 = vmatprep.mubr.msk.bf16.mxu1 %vm2697_vm8, %v3638_v47 }
 0x6a2   :  { %1821 = vmatpush1.bf16.msra.mxu0 %v3297_v44  ;;  %2350 = vmatpush3.bf16.msra.mxu1 %v3366_v54 }
 0x6a3   :  { %1822 = vmatprep.subr.bf16.mxu0 %v3372_v13  ;;  %2351 = vmatprep.subr.bf16.mxu1 %v3638_v47 }
 0x6a6   :  { %1823 = vmatpush1.bf16.msra.mxu0 %v3379_v45  ;;  %2352 = vmatpush3.bf16.msra.mxu1 %v3385_v46 }
 0x6a7   :  { %1824 = vmatprep.subr.bf16.mxu0 %v3391_v49  ;;  %2353 = vmatprep.subr.bf16.mxu1 %v3638_v47 }
 0x6aa   :  { %1825 = vmatpush1.bf16.msra.mxu0 %v3398_v51  ;;  %2354 = vmatpush3.bf16.msra.mxu1 %v3404_v52 }
 0x6ab   :  { %1826 = vmatprep.subr.bf16.mxu0 %v3410_v53  ;;  %2355 = vmatprep.subr.bf16.mxu1 %v3638_v47 }
 0x6ae   :  { %1827 = vmatpush1.bf16.msra.mxu0 %v3417_v55  ;;  %2356 = vmatpush3.bf16.msra.mxu1 %v3423_v57 }
 0x6af   :  { %1828 = vmatprep.subr.bf16.mxu0 %v3429_v59  ;;  %2357 = vmatprep.subr.bf16.mxu1 %v3638_v47 }
 0x6b2   :  { %1829 = vmatpush1.bf16.msra.mxu0 %v3436_v26  ;;  %2358 = vmatpush3.bf16.msra.mxu1 %v3515_v48 }
 0x6b3   :  { %1830 = vmatprep.subr.bf16.mxu0 %v3443_v22  ;;  %2359 = vmatprep.subr.bf16.mxu1 %v3638_v47 }
 0x6b6   :  { %1831 = vmatpush1.bf16.msra.mxu0 %v3450_v30  ;;  %2360 = vmatpush3.bf16.msra.mxu1 %v3524_v40 }
 0x6b7   :  { %1832 = vmatprep.subr.bf16.mxu0 %v3457_v63  ;;  %2361 = vmatprep.subr.bf16.mxu1 %v3638_v47 }
 0x6ba   :  { %1833 = vmatpush1.bf16.msra.mxu0 %v3464_v17  ;;  %2362 = vmatpush3.bf16.msra.mxu1 %v3533_v10 }
 0x770   :  { %v1700_v3 = vpop.f32.mrb[24].mxu0  ;;  %v1743_v19 = vpop.f32.mrb[40].mxu1 }
 0x771   :  { %v2391_v33 = vadd.f32 %v1700_v3, %v3142_v39  ;;  %v1702_v44 = vpop.f32.mrb[25].mxu0  ;;  %v2345_v43 = vpop.f32.mrb[41].mxu1  ;;  %v1778_v48 = vadd.f32 %v3596_v62, %v1743_v19 }
 0x772   :  { %v1704_v54 = vpop.f32.mrb[26].mxu0  ;;  %v1746_v13 = vpop.f32.mrb[42].mxu1  ;;  %v2392_v52 = vadd.f32 %v1702_v44, %v3144_v50 }
 0x773   :  { %v2074_v45 = vmul.f32 -1.442695, %v2391_v33  ;;  %v2393_v46 = vadd.f32 %v1704_v54, %v3142_v39  ;;  %v1706_v49 = vpop.f32.mrb[27].mxu0  ;;  %v2346_v51 = vpop.f32.mrb[43].mxu1  ;;  %v1779_v24 = vadd.f32 %v3596_v62, %v1746_v13 }
 0x774   :  { %v2394_v53 = vadd.f32 %v1706_v49, %v3144_v50  ;;  %v2076_v55 = vmul.f32 -1.442695, %v2392_v52 }
 0x775   :  { %2629 = vpow2.f32 %v2074_v45  ;;  %v2075_v47 = vmul.f32 -1.442695, %v2393_v46 }
 0x776   :  { %v2077_v57 = vmul.f32 -1.442695, %v2394_v53 }
 0x777   :  { %2631 = vpow2.f32 %v2075_v47 }
 0x778   :  { %2633 = vpow2.f32 %v2076_v55 }
 0x779   :  { %2635 = vpow2.f32 %v2077_v57 }
 0x77f   :  { %v2630_v59 = vpop.eup %2629 }
 0x780   :  { %v1758_v26 = vadd.f32 1.0, %v2630_v59 }
 0x781   :  { %v2632_v22 = vpop.eup %2631 }
 0x782   :  { %2637 = vrcp.f32 %v1758_v26  ;;  %v1759_v30 = vadd.f32 1.0, %v2632_v22  ;;  %v2634_v63 = vpop.eup %2633  ;;  %v3640_v22 = vld [vmem:[#allocation5_spill] sm:$0xff] }
 0x783   :  { %v2636_v17 = vpop.eup %2635  ;;  %v1772_v4 = vadd.f32 1.0, %v2634_v63 }
 0x784   :  { %2639 = vrcp.f32 %v1759_v30  ;;  %v1773_v40 = vadd.f32 1.0, %v2636_v17 }
 0x785   :  { %2641 = vrcp.f32 %v1772_v4 }
 0x786   :  { %2643 = vrcp.f32 %v1773_v40 }
 0x78c   :  { %v2638_v10 = vpop.eup %2637 }
 0x78d   :  { %v1780_v8 = vmul.f32 %v2638_v10, %v1778_v48 }
 0x78e   :  { %v2640_v21 = vpop.eup %2639 }
 0x78f   :  { %v1782_v12 = vadd.f32 %v1780_v8, %v3134_v11  ;;  %v1781_v25 = vmul.f32 %v2640_v21, %v1779_v24  ;;  %v2642_v5 = vpop.eup %2641  ;;  %v1802_v11 = vpop.permute.xlu0 %1801 }
 0x790   :  { %v2644_v20 = vpop.eup %2643  ;;  %v1786_v61 = vsub.f32 1.0, %v2642_v5  ;;  %v1790_v35 = vmul.f32 %v2642_v5, %v3549_v0  ;;  %vm1806_vm8 = vcmp.eq.s32.totalorder %v1802_v11, 1 }
 0x791   :  { %2645 = vtanh.f32 %v1782_v12  ;;  %v1783_v28 = vadd.f32 %v1781_v25, %v3140_v16  ;;  %v1787_v7 = vsub.f32 1.0, %v2644_v20  ;;  %v1791_v37 = vmul.f32 %v2644_v20, %v3552_v56  ;;  %v1957_v12 = vpop.permute.xlu1 %1956 }
 0x792   :  { %vm1959_vm0 = vcmp.eq.s32.totalorder %v1957_v12, 1 }
 0x793   :  { %2647 = vtanh.f32 %v1783_v28  ;;  %v1954_v40 = vpop.permute.xlu0 %1953 }
 0x794   :  { %vm1958_vm15 = vcmp.eq.s32.totalorder %v1954_v40, 1 }
 0x79b   :  { %v2646_v23 = vpop.eup %2645 }
 0x79c   :  { %v1788_v42 = vmul.f32 %v2646_v23, %v1786_v61 }
 0x79d   :  { %v2648_v6 = vpop.eup %2647 }
 0x79e   :  { %v1789_v31 = vmul.f32 %v2648_v6, %v1787_v7  ;;  %v1792_v32 = vadd.f32 %v1790_v35, %v1788_v42 }
 0x7a0   :  { %v1793_v36 = vadd.f32 %v1791_v37, %v1789_v31  ;;  %v1808_v16 = vsel %vm1806_vm8, %v1792_v32, %v3549_v0 }
 0x7a2   :  { %v3606_v15 = vsel %vm1807_vm14, %v1793_v36, %v3552_v56 }
 0x7a3   :  { %v1817_v41 = vpack.c.bf16 %v3606_v15, %v1808_v16 }
 0x7a5   :  { %1851 = vmatmul.mubr.bf16.vlgmr.msra.gmra.mrb[28].mxu0 %v1817_v41  ;;  %2364 = vmatmul.mubr.bf16.vlgmr.msra.gmra.mrb[44].mxu1 %v1817_v41 }
 0x878   :  { %v1852_v1 = vpop.f32.mrb[28].mxu0  ;;  %v1895_v27 = vpop.f32.mrb[44].mxu1 }
 0x879   :  { %v2395_v60 = vadd.f32 %v1852_v1, %v3142_v39  ;;  %v1854_v38 = vpop.f32.mrb[29].mxu0  ;;  %v2365_v14 = vpop.f32.mrb[45].mxu1  ;;  %v1930_v52 = vadd.f32 %v3596_v62, %v1895_v27 }
 0x87a   :  { %v1856_v58 = vpop.f32.mrb[30].mxu0  ;;  %v1898_v29 = vpop.f32.mrb[46].mxu1  ;;  %v2396_v56 = vadd.f32 %v1854_v38, %v3144_v50 }
 0x87b   :  { %v2080_v18 = vmul.f32 -1.442695, %v2395_v60  ;;  %v2397_v2 = vadd.f32 %v1856_v58, %v3142_v39  ;;  %v1858_v3 = vpop.f32.mrb[31].mxu0  ;;  %v2366_v0 = vpop.f32.mrb[47].mxu1 }
 0x87c   :  { %v2398_v33 = vadd.f32 %v1858_v3, %v3144_v50  ;;  %v2082_v44 = vmul.f32 -1.442695, %v2396_v56  ;;  %v1931_v50 = vadd.f32 %v3596_v62, %v1898_v29 }
 0x87d   :  { %2649 = vpow2.f32 %v2080_v18  ;;  %v2081_v19 = vmul.f32 -1.442695, %v2397_v2 }
 0x87e   :  { %v2083_v43 = vmul.f32 -1.442695, %v2398_v33 }
 0x87f   :  { %2651 = vpow2.f32 %v2081_v19 }
 0x880   :  { %2653 = vpow2.f32 %v2082_v44 }
 0x881   :  { %2655 = vpow2.f32 %v2083_v43 }
 0x887   :  { %v2650_v54 = vpop.eup %2649 }
 0x888   :  { %v1910_v13 = vadd.f32 1.0, %v2650_v54 }
 0x889   :  { %v2652_v45 = vpop.eup %2651 }
 0x88a   :  { %2657 = vrcp.f32 %v1910_v13  ;;  %v1911_v46 = vadd.f32 1.0, %v2652_v45  ;;  %v2654_v39 = vpop.eup %2653 }
 0x88b   :  { %v2656_v49 = vpop.eup %2655  ;;  %v1924_v51 = vadd.f32 1.0, %v2654_v39 }
 0x88c   :  { %2659 = vrcp.f32 %v1911_v46  ;;  %v1925_v47 = vadd.f32 1.0, %v2656_v49 }
 0x88d   :  { %2661 = vrcp.f32 %v1924_v51 }
 0x88e   :  { %2663 = vrcp.f32 %v1925_v47 }
 0x894   :  { %v2658_v53 = vpop.eup %2657 }
 0x895   :  { %v1932_v55 = vmul.f32 %v2658_v53, %v1930_v52 }
 0x896   :  { %v2660_v57 = vpop.eup %2659 }
 0x897   :  { %v1934_v59 = vadd.f32 %v1932_v55, %v3131_v9  ;;  %v1933_v26 = vmul.f32 %v2660_v57, %v1931_v50  ;;  %v2662_v63 = vpop.eup %2661 }
 0x898   :  { %v2664_v17 = vpop.eup %2663  ;;  %v1938_v4 = vsub.f32 1.0, %v2662_v63  ;;  %v1942_v8 = vmul.f32 %v2662_v63, %v1808_v16 }
 0x899   :  { %2665 = vtanh.f32 %v1934_v59  ;;  %v1935_v30 = vadd.f32 %v1933_v26, %v3640_v22  ;;  %v1939_v24 = vsub.f32 1.0, %v2664_v17  ;;  %v1943_v9 = vmul.f32 %v2664_v17, %v3606_v15 }
 0x89b   :  { %2667 = vtanh.f32 %v1935_v30 }
 0x8a3   :  { %v2666_v48 = vpop.eup %2665 }
 0x8a4   :  { %v1940_v10 = vmul.f32 %v2666_v48, %v1938_v4 }
 0x8a5   :  { %v2668_v21 = vpop.eup %2667 }
 0x8a6   :  { %v1944_v62 = vadd.f32 %v1942_v8, %v1940_v10  ;;  %v1941_v25 = vmul.f32 %v2668_v21, %v1939_v24 }
 0x8a8   :  { %v1960_v28 = vsel %vm1958_vm15, %v1944_v62, %v1808_v16  ;;  %v1945_v5 = vadd.f32 %v1943_v9, %v1941_v25 }
 0x8a9   :  { %1962 = vst [vmem:[%s3631_s7] sm:$0xff] %v1960_v28 }
 0x8aa   :  { %v1961_v20 = vsel %vm1959_vm0, %v1945_v5, %v3606_v15 }
 0x8ab   :  { %1963 = vst [vmem:[%s3631_s7 + $0x8] sm:$0xff] %v1961_v20 }
 0x8ac PF:  {}

</bundles_post_ra>
